<compile_context>
chip_gen: v6e
topology: v6e:2x2x1
jax: 0.10.0
libtpu: 0.0.40
codegen_flags: <defaults>
</compile_context>

<pallas_src>
import functools

import numpy as np

import jax
import jax.numpy as jnp
from jax.experimental import pallas as pl
from jax.experimental.pallas import tpu as pltpu


def _warp_kernel(xy_ref, im_ref, out_ref, *, max_x, max_y, wp, kc, n_chunks):
    # xy_ref : (1, 2, TN)          row 0 = x (col), row 1 = y (row), already +1 pad-shifted
    # im_ref : (1, NC, C, KC)      zero-padded image slab, channels-major, pre-chunked along K
    # out_ref: (1, C, TN)          lane-dense output tile
    xy = xy_ref[0]                                              # (2, TN)
    xc = jnp.clip(xy[0:1, :], 0.0, max_x)                       # (1, TN) clamped sample col
    yc = jnp.clip(xy[1:2, :], 0.0, max_y)                       # (1, TN) clamped sample row

    c_dim, tn = out_ref.shape[1], out_ref.shape[2]
    inv_wp = 1.0 / wp

    def chunk_step(c, acc):
        im_c = im_ref[0, c]                                     # (C, KC) chunk of the slab
        # Row/col coords of this chunk's flattened padded-image entries, built in-kernel
        # (no lane-padded (Kp, 2) side table).  The +0.5 keeps the f32 floor-division exact
        # (verified at trace time in the wrapper).
        k = (jax.lax.broadcasted_iota(jnp.int32, (kc, 1), 0) + c * kc).astype(jnp.float32)
        ky = jnp.floor((k + 0.5) * inv_wp)                      # (KC, 1) padded row index
        kx = k - ky * wp                                        # (KC, 1) padded col index
        # Separable "tent" bilinear weights -- exact rewrite of the module's clamped
        # 4-corner weights (incl. coincident corners at borders; zero on the K tail).
        ry = jnp.maximum(1.0 - jnp.abs(ky - yc), 0.0)           # (KC, TN)
        rx = jnp.maximum(1.0 - jnp.abs(kx - xc), 0.0)           # (KC, TN)
        # One MXU matmul per chunk = 4-corner gather + weighted sum for all channels.
        return acc + jnp.dot(im_c, ry * rx, preferred_element_type=jnp.float32)

    acc = jax.lax.fori_loop(0, n_chunks, chunk_step,
                            jnp.zeros((c_dim, tn), jnp.float32), unroll=True)
    out_ref[0] = acc


def _pick_tn(n, kc, temp_budget_bytes):
    """Largest pixel tile dividing N (preferring multiples of 256 for the v6e/v7x MXU,
    falling back to 128) such that the three (KC, TN) f32 weight-build temporaries
    (ry, rx, m) stay under temp_budget_bytes."""
    if n % 128 != 0:
        return n                        # small / odd sizes: one tile per batch element
    cap = max(128, (temp_budget_bytes // (3 * 4 * kc)) // 128 * 128)
    cap = min(cap, n)
    for align in (256, 128):
        tn = cap // align * align
        while tn >= align:
            if n % tn == 0:
                return tn
            tn -= align
    return n


def spatial_transformation(moving_image, deformation_matrix, *, tn=None, kc=512):
    """Pallas implementation of SpatialTransformation.forward (NHWC in, NHWC f32 out)."""
    B, H, W, C = moving_image.shape
    assert deformation_matrix.shape == (B, H, W, 2)
    Hp, Wp = H + 2, W + 2               # padded image dims (F.pad adds 1 on each side of H, W)
    N = H * W                           # output pixels per batch element
    K = Hp * Wp                         # flattened padded-image (contraction) axis

    # Contraction-axis chunking: KC multiple of 256, Kp padded so chunks divide evenly.
    kc = max(256, (kc // 256) * 256)
    Kp = ((K + 255) // 256) * 256
    if Kp <= kc:
        kc = Kp
    else:
        Kp = ((Kp + kc - 1) // kc) * kc
    n_chunks = Kp // kc

    # The kernel reconstructs (ky, kx) = (k // Wp, k % Wp) from an f32 iota; verify at trace
    # time that the float floor-division path is exact for this image size.
    ks = np.arange(Kp, dtype=np.float32)
    ky_np = np.floor((ks + np.float32(0.5)) * np.float32(1.0 / Wp)).astype(np.int64)
    assert np.array_equal(ky_np, np.arange(Kp) // Wp), (
        "f32 row-index reconstruction inexact for this size; use the DMA-gather path (TODO)")

    # ---- wrapper-side glue (plain JAX / XLA) -----------------------------------------
    # Padded image -> channels-major, flattened, zero-padded to Kp, pre-chunked along K:
    # (B, n_chunks, C, KC).  (The PyTorch module casts the image to float before gathering.)
    im_pad = jnp.pad(moving_image.astype(jnp.float32), ((0, 0), (1, 1), (1, 1), (0, 0)))
    im_ck = jnp.transpose(im_pad, (0, 3, 1, 2)).reshape(B, C, K)
    if Kp > K:
        im_ck = jnp.pad(im_ck, ((0, 0), (0, 0), (0, Kp - K)))
    im_slab = im_ck.reshape(B, C, n_chunks, kc).transpose(0, 2, 1, 3)

    # Sample coordinates (meshgrid + deformation + the +1 pad shift), packed lane-dense.
    col = jnp.arange(W, dtype=jnp.float32)[None, :]
    row = jnp.arange(H, dtype=jnp.float32)[:, None]
    x = (deformation_matrix[..., 0].astype(jnp.float32) + col + 1.0).reshape(B, 1, N)
    y = (deformation_matrix[..., 1].astype(jnp.float32) + row + 1.0).reshape(B, 1, N)
    xy = jnp.concatenate([x, y], axis=1)                        # (B, 2, N)

    # Generation-aware VMEM budgets (v7x: 64 MiB / TensorCore; v5e/v6e: 128 MiB).
    try:
        vmem_cap = int(pltpu.get_tpu_info().vmem_capacity_bytes)
    except Exception:
        vmem_cap = 64 * 1024 * 1024     # conservative fallback (v7x per-TC capacity)
    vmem_limit = max(32 << 20, min(int(0.70 * vmem_cap), vmem_cap - (16 << 20)))
    vmem_limit = min(vmem_limit, vmem_cap)
    if tn is None:
        tn = _pick_tn(N, kc, vmem_limit // 2)
    assert N % tn == 0

    kernel = functools.partial(_warp_kernel, max_x=float(Wp - 1), max_y=float(Hp - 1),
                               wp=float(Wp), kc=kc, n_chunks=n_chunks)

    out_bcn = pl.pallas_call(
        kernel,
        out_shape=jax.ShapeDtypeStruct((B, C, N), jnp.float32),
        grid_spec=pltpu.PrefetchScalarGridSpec(
            num_scalar_prefetch=0,
            grid=(B, N // tn),
            in_specs=[
                pl.BlockSpec((1, 2, tn), lambda b, t: (b, 0, t)),              # packed coords
                pl.BlockSpec((1, n_chunks, C, kc), lambda b, t: (b, 0, 0, 0)),  # image slab
            ],
            out_specs=pl.BlockSpec((1, C, tn), lambda b, t: (b, 0, t)),
        ),
        compiler_params=pltpu.CompilerParams(
            dimension_semantics=("parallel", "parallel"),
            vmem_limit_bytes=int(vmem_limit),
        ),
    )(xy, im_slab)

    # (B, C, N) -> NHWC (optional if the consumer accepts channels-first).
    return jnp.transpose(out_bcn, (0, 2, 1)).reshape(B, H, W, C)


def reference(moving_image, deformation_matrix):
    """Pure-JAX reference mirroring the PyTorch forward (for correctness check)."""
    B, H, W, C = moving_image.shape
    Hp, Wp = H + 2, W + 2
    im = jnp.pad(moving_image.astype(jnp.float32), ((0, 0), (1, 1), (1, 1), (0, 0)))
    col = jnp.arange(W, dtype=jnp.float32)[None, :]
    row = jnp.arange(H, dtype=jnp.float32)[:, None]
    x = deformation_matrix[..., 0].astype(jnp.float32) + col + 1.0
    y = deformation_matrix[..., 1].astype(jnp.float32) + row + 1.0
    x0f = jnp.floor(x)
    y0f = jnp.floor(y)
    x0 = jnp.clip(x0f, 0.0, Wp - 1.0)
    x1 = jnp.clip(x0f + 1.0, 0.0, Wp - 1.0)
    y0 = jnp.clip(y0f, 0.0, Hp - 1.0)
    y1 = jnp.clip(y0f + 1.0, 0.0, Hp - 1.0)
    ddx = x1 - x
    ddy = y1 - y
    wa, wb = ddx * ddy, ddx * (1 - ddy)
    wc, wd = (1 - ddx) * ddy, (1 - ddx) * (1 - ddy)
    im_flat = im.reshape(B, Hp * Wp, C)

    def gather(iy, ix):
        idx = (iy.astype(jnp.int32) * Wp + ix.astype(jnp.int32)).reshape(B, -1)
        return jax.vmap(lambda f, i: jnp.take(f, i, axis=0))(im_flat, idx)

    Ia, Ib = gather(y0, x0), gather(y1, x0)
    Ic, Id = gather(y0, x1), gather(y1, x1)
    w = lambda a: a.reshape(B, -1, 1)
    out = w(wa) * Ia + w(wb) * Ib + w(wc) * Ic + w(wd) * Id
    return out.reshape(B, H, W, C)


if __name__ == "__main__":
    key = jax.random.PRNGKey(0)
    k1, k2 = jax.random.split(key)
    B, H, W, C = 2, 16, 16, 4
    moving_image = jax.random.normal(k1, (B, H, W, C), dtype=jnp.float32)
    # Deformations of a few pixels, including negative / out-of-range to exercise clamping.
    deformation = 3.0 * jax.random.normal(k2, (B, H, W, 2), dtype=jnp.float32)

    # tn=128 exercises the tiled pixel grid (N=256 -> 2 tiles); kc=256 exercises the
    # in-kernel contraction chunk loop (Kp=512 -> 2 chunks) even at this small size.
    out = spatial_transformation(moving_image, deformation, tn=128, kc=256)
    out = jax.block_until_ready(out)

    ref = jax.block_until_ready(reference(moving_image, deformation))
    assert out.shape == (B, H, W, C)
    assert jnp.allclose(out, ref, atol=1e-4, rtol=1e-4), "mismatch vs reference"

    print("KERNEL_OK")
</pallas_src>

<mosaic_0001>
module attributes {stable_mosaic.version = 11 : i64} {
  func.func @_warp_kernel(%arg0: i32, %arg1: i32, %arg2: memref<1x2x128xf32, #tpu.memory_space<vmem>>, %arg3: memref<1x2x4x256xf32, #tpu.memory_space<vmem>>, %arg4: memref<1x4x128xf32, #tpu.memory_space<vmem>>) attributes {dimension_semantics = [#tpu.dimension_semantics<parallel>, #tpu.dimension_semantics<parallel>], iteration_bounds = array<i64: 2, 2>, scalar_prefetch = 0 : i64, scratch_operands = 0 : i64, tpu.core_type = #tpu.core_type<tc>, window_params = [{transform_indices = @transform_0, window_bounds = array<i64: 1, 2, 128>}, {transform_indices = @transform_1, window_bounds = array<i64: 1, 2, 4, 256>}, {transform_indices = @transform_2, window_bounds = array<i64: 1, 4, 128>}]} {
    %c0 = arith.constant 0 : index
    %c0_0 = arith.constant 0 : index
    %c0_1 = arith.constant 0 : index
    %0 = vector.load %arg2[%c0, %c0_0, %c0_1] : memref<1x2x128xf32, #tpu.memory_space<vmem>>, vector<1x2x128xf32>
    %1 = vector.shape_cast %0 : vector<1x2x128xf32> to vector<2x128xf32>
    %2 = vector.extract_strided_slice %1 {offsets = [0, 0], sizes = [1, 128], strides = [1, 1]} : vector<2x128xf32> to vector<1x128xf32>
    %cst = arith.constant 0.000000e+00 : f32
    %cst_2 = arith.constant 1.700000e+01 : f32
    %3 = vector.broadcast %cst : f32 to vector<1x128xf32>
    %4 = arith.maximumf %3, %2 : vector<1x128xf32>
    %5 = vector.broadcast %cst_2 : f32 to vector<1x128xf32>
    %6 = arith.minimumf %5, %4 : vector<1x128xf32>
    %7 = vector.extract_strided_slice %1 {offsets = [1, 0], sizes = [1, 128], strides = [1, 1]} : vector<2x128xf32> to vector<1x128xf32>
    %cst_3 = arith.constant 0.000000e+00 : f32
    %cst_4 = arith.constant 1.700000e+01 : f32
    %8 = vector.broadcast %cst_3 : f32 to vector<1x128xf32>
    %9 = arith.maximumf %8, %7 : vector<1x128xf32>
    %10 = vector.broadcast %cst_4 : f32 to vector<1x128xf32>
    %11 = arith.minimumf %10, %9 : vector<1x128xf32>
    %cst_5 = arith.constant 0.000000e+00 : f32
    %12 = vector.broadcast %cst_5 : f32 to vector<4x128xf32>
    %c0_i32 = arith.constant 0 : i32
    %c0_6 = arith.constant 0 : index
    %13 = arith.index_cast %c0_i32 : i32 to index
    %c0_7 = arith.constant 0 : index
    %c0_8 = arith.constant 0 : index
    %14 = vector.load %arg3[%c0_6, %13, %c0_7, %c0_8] : memref<1x2x4x256xf32, #tpu.memory_space<vmem>>, vector<1x1x4x256xf32>
    %15 = vector.shape_cast %14 : vector<1x1x4x256xf32> to vector<4x256xf32>
    %16 = tpu.iota {dimensions = array<i32: 0>} : vector<256x1xi32>
    %c256_i32 = arith.constant 256 : i32
    %17 = arith.muli %c0_i32, %c256_i32 : i32
    %18 = vector.broadcast %17 : i32 to vector<256x1xi32>
    %19 = arith.addi %16, %18 : vector<256x1xi32>
    %20 = arith.sitofp %19 : vector<256x1xi32> to vector<256x1xf32>
    %cst_9 = arith.constant 5.000000e-01 : f32
    %21 = vector.broadcast %cst_9 : f32 to vector<256x1xf32>
    %22 = arith.addf %20, %21 : vector<256x1xf32>
    %cst_10 = arith.constant 0.055555556 : f32
    %23 = vector.broadcast %cst_10 : f32 to vector<256x1xf32>
    %24 = arith.mulf %22, %23 : vector<256x1xf32>
    %25 = math.floor %24 : vector<256x1xf32>
    %cst_11 = arith.constant 1.800000e+01 : f32
    %26 = vector.broadcast %cst_11 : f32 to vector<256x1xf32>
    %27 = arith.mulf %25, %26 : vector<256x1xf32>
    %28 = arith.subf %20, %27 : vector<256x1xf32>
    %29 = vector.broadcast %25 : vector<256x1xf32> to vector<256x128xf32>
    %30 = vector.broadcast %11 : vector<1x128xf32> to vector<256x128xf32>
    %31 = arith.subf %29, %30 : vector<256x128xf32>
    %32 = math.absf %31 : vector<256x128xf32>
    %cst_12 = arith.constant 1.000000e+00 : f32
    %33 = vector.broadcast %cst_12 : f32 to vector<256x128xf32>
    %34 = arith.subf %33, %32 : vector<256x128xf32>
    %cst_13 = arith.constant 0.000000e+00 : f32
    %35 = vector.broadcast %cst_13 : f32 to vector<256x128xf32>
    %36 = arith.maximumf %34, %35 : vector<256x128xf32>
    %37 = vector.broadcast %28 : vector<256x1xf32> to vector<256x128xf32>
    %38 = vector.broadcast %6 : vector<1x128xf32> to vector<256x128xf32>
    %39 = arith.subf %37, %38 : vector<256x128xf32>
    %40 = math.absf %39 : vector<256x128xf32>
    %cst_14 = arith.constant 1.000000e+00 : f32
    %41 = vector.broadcast %cst_14 : f32 to vector<256x128xf32>
    %42 = arith.subf %41, %40 : vector<256x128xf32>
    %cst_15 = arith.constant 0.000000e+00 : f32
    %43 = vector.broadcast %cst_15 : f32 to vector<256x128xf32>
    %44 = arith.maximumf %42, %43 : vector<256x128xf32>
    %45 = arith.mulf %36, %44 : vector<256x128xf32>
    %cst_16 = arith.constant dense<0.000000e+00> : vector<4x128xf32>
    %46 = tpu.matmul %15, %45, %cst_16 {dimension_numbers = #tpu.dot_dimension_numbers<[1], [0], [0], [1], [0, 0, 1, 1], [], []>} : vector<4x256xf32>, vector<256x128xf32>, vector<4x128xf32> -> vector<4x128xf32>
    %47 = arith.addf %12, %46 : vector<4x128xf32>
    %c1_i32 = arith.constant 1 : i32
    %c0_17 = arith.constant 0 : index
    %48 = arith.index_cast %c1_i32 : i32 to index
    %c0_18 = arith.constant 0 : index
    %c0_19 = arith.constant 0 : index
    %49 = vector.load %arg3[%c0_17, %48, %c0_18, %c0_19] : memref<1x2x4x256xf32, #tpu.memory_space<vmem>>, vector<1x1x4x256xf32>
    %50 = vector.shape_cast %49 : vector<1x1x4x256xf32> to vector<4x256xf32>
    %51 = tpu.iota {dimensions = array<i32: 0>} : vector<256x1xi32>
    %c256_i32_20 = arith.constant 256 : i32
    %52 = arith.muli %c1_i32, %c256_i32_20 : i32
    %53 = vector.broadcast %52 : i32 to vector<256x1xi32>
    %54 = arith.addi %51, %53 : vector<256x1xi32>
    %55 = arith.sitofp %54 : vector<256x1xi32> to vector<256x1xf32>
    %cst_21 = arith.constant 5.000000e-01 : f32
    %56 = vector.broadcast %cst_21 : f32 to vector<256x1xf32>
    %57 = arith.addf %55, %56 : vector<256x1xf32>
    %cst_22 = arith.constant 0.055555556 : f32
    %58 = vector.broadcast %cst_22 : f32 to vector<256x1xf32>
    %59 = arith.mulf %57, %58 : vector<256x1xf32>
    %60 = math.floor %59 : vector<256x1xf32>
    %cst_23 = arith.constant 1.800000e+01 : f32
    %61 = vector.broadcast %cst_23 : f32 to vector<256x1xf32>
    %62 = arith.mulf %60, %61 : vector<256x1xf32>
    %63 = arith.subf %55, %62 : vector<256x1xf32>
    %64 = vector.broadcast %60 : vector<256x1xf32> to vector<256x128xf32>
    %65 = vector.broadcast %11 : vector<1x128xf32> to vector<256x128xf32>
    %66 = arith.subf %64, %65 : vector<256x128xf32>
    %67 = math.absf %66 : vector<256x128xf32>
    %cst_24 = arith.constant 1.000000e+00 : f32
    %68 = vector.broadcast %cst_24 : f32 to vector<256x128xf32>
    %69 = arith.subf %68, %67 : vector<256x128xf32>
    %cst_25 = arith.constant 0.000000e+00 : f32
    %70 = vector.broadcast %cst_25 : f32 to vector<256x128xf32>
    %71 = arith.maximumf %69, %70 : vector<256x128xf32>
    %72 = vector.broadcast %63 : vector<256x1xf32> to vector<256x128xf32>
    %73 = vector.broadcast %6 : vector<1x128xf32> to vector<256x128xf32>
    %74 = arith.subf %72, %73 : vector<256x128xf32>
    %75 = math.absf %74 : vector<256x128xf32>
    %cst_26 = arith.constant 1.000000e+00 : f32
    %76 = vector.broadcast %cst_26 : f32 to vector<256x128xf32>
    %77 = arith.subf %76, %75 : vector<256x128xf32>
    %cst_27 = arith.constant 0.000000e+00 : f32
    %78 = vector.broadcast %cst_27 : f32 to vector<256x128xf32>
    %79 = arith.maximumf %77, %78 : vector<256x128xf32>
    %80 = arith.mulf %71, %79 : vector<256x128xf32>
    %cst_28 = arith.constant dense<0.000000e+00> : vector<4x128xf32>
    %81 = tpu.matmul %50, %80, %cst_28 {dimension_numbers = #tpu.dot_dimension_numbers<[1], [0], [0], [1], [0, 0, 1, 1], [], []>} : vector<4x256xf32>, vector<256x128xf32>, vector<4x128xf32> -> vector<4x128xf32>
    %82 = arith.addf %47, %81 : vector<4x128xf32>
    %c2_i32 = arith.constant 2 : i32
    %c0_29 = arith.constant 0 : index
    %c0_30 = arith.constant 0 : index
    %c0_31 = arith.constant 0 : index
    %83 = vector.load %arg4[%c0_29, %c0_30, %c0_31] : memref<1x4x128xf32, #tpu.memory_space<vmem>>, vector<1x4x128xf32>
    %84 = vector.shape_cast %83 : vector<1x4x128xf32> to vector<4x128xf32>
    %85 = vector.shape_cast %82 : vector<4x128xf32> to vector<1x4x128xf32>
    tpu.vector_store %arg4[%c0_29, %c0_30, %c0_31], %85 {strides = array<i32>} : memref<1x4x128xf32, #tpu.memory_space<vmem>>, vector<1x4x128xf32>,
    return
  }
  func.func @transform_0(%arg0: i32, %arg1: i32) -> (i32, i32, i32) {
    %c0_i32 = arith.constant 0 : i32
    %c0_i32_0 = arith.constant 0 : i32
    return %arg0, %c0_i32, %arg1 : i32, i32, i32
  }
  func.func @transform_1(%arg0: i32, %arg1: i32) -> (i32, i32, i32, i32) {
    %c0_i32 = arith.constant 0 : i32
    %c0_i32_0 = arith.constant 0 : i32
    %c0_i32_1 = arith.constant 0 : i32
    %c0_i32_2 = arith.constant 0 : i32
    return %arg0, %c0_i32, %c0_i32_0, %c0_i32_1 : i32, i32, i32, i32
  }
  func.func @transform_2(%arg0: i32, %arg1: i32) -> (i32, i32, i32) {
    %c0_i32 = arith.constant 0 : i32
    %c0_i32_0 = arith.constant 0 : i32
    return %arg0, %c0_i32, %arg1 : i32, i32, i32
  }
}

</mosaic_0001>

<bundles_post_ra>
// kernel: tpu_custom_call.1
= control target key start
LH: loop header
LB: loop body
LE: loop exit
PB: predicated region body
PF: predicated region fallthrough
CT: control target
= control target key end

     0   :  { %s2476_s0 = inlined_call_operand.hbm [shape: f32[2,2,256], index: 0, kind: input, shape index: {}]   ;;  %s2477_s1 = inlined_call_operand.hbm [shape: f32[2,2,4,256], index: 1, kind: input, shape index: {}]   ;;  %s2478_s2 = inlined_call_operand.hbm [shape: f32[2,4,256], index: 2, kind: output, shape index: {}]  }
   0x1   :  { %2484 = sst [smem:[#allocation15_spill]] %s2476_s0 }
   0x2   :  { %7 = vsyncpa [#allocation3], 0 }
   0x3   :  { %9 = vsyncpa [#allocation3 + $0x1], 0 }
   0x4   :  { %10 = vsyncpa [#allocation6], 0 }
   0x5   :  { %12 = vsyncpa [#allocation6 + $0x1], 0 }
   0x6   :  { %13 = vsyncpa [#allocation4], 0 }
   0x7   :  { %15 = vsyncpa [#allocation4 + $0x1], 0  ;;  %s1931_s9 = smov 0   ;;  %s1933_s10 = smov 0  }
   0x8   :  { %s1935_s11 = smov 0   ;;  %s1937_s12 = smov 0  }
   0x9   :  { %s1939_s13 = smov 0   ;;  %s1941_s14 = smov 0  }
   0xa   :  { %s1943_s15 = smov 0   ;;  %s1945_s16 = smov 0  }
   0xb   :  { %s1947_s17 = smov 0   ;;  %s1949_s18 = smov 0  }
   0xc   :  { %s1951_s19 = smov 0  }
   0xd LB: > { %2485 = sst [smem:[#allocation11_spill]] %s1889_s14  ;;  %s1527_s20 = sadd.s32 4294967295, %s1909_s19   ;;  %s1909_s19 = sphi %s1951_s19, %s21_s19   ;;  %s1905_s18 = sphi %s1949_s18, %s2515_s18   ;;  %s1901_s17 = sphi %s1947_s17, %s2514_s17   ;;  %s1897_s16 = sphi %s1945_s16, %s2513_s16   ;;  %s1893_s15 = sphi %s1943_s15, %s2512_s15   ;;  %s1889_s14 = sphi %s1941_s14, %s2504_s14   ;;  %s1885_s13 = sphi %s1939_s13, %s2511_s13   ;;  %s1881_s12 = sphi %s1937_s12, %s2510_s12   ;;  %s1877_s11 = sphi %s1935_s11, %s2509_s11   ;;  %s1873_s10 = sphi %s1933_s10, %s2508_s10   ;;  %s1869_s9 = sphi %s1931_s9, %s2507_s9  }
   0xe   : > { %s1528_s21 = sadd.s32 4294967294, %s1909_s19   ;;  %s30_s22 = sadd.s32 1, %s1901_s17 }
   0xf   : > { %s33_s23 = sadd.s32 1, %s1905_s18  ;;  %p31_p0 = scmp.ge.s32.totalorder %s30_s22, 2 }
  0x10   : > { %s42_s24 = sadd.s32 1, %s1889_s14  ;;  %p49_p1 = scmp.ne.s32.totalorder %s1889_s14, %s1885_s13 }
  0x11   : > { %p50_p2 = scmp.eq.s32.totalorder %s1909_s19, 0  ;;  %s2517_s22 = smov (%p31_p0, %s30_s22), 0 }
  0x12   : > { %2486 = sst [smem:[#allocation12_spill]] %s2517_s22  ;;  %s2519_s23 = smov (!%p31_p0, %s33_s23), %s1905_s18 }
  0x13   : > { %s38_s25 = ssub.s32 %s1901_s17, %s2517_s22  ;;  %p2004_p3 = por %p50_p2, %p49_p1 }
  0x14   : > { %p35_p4 = scmp.ge.s32.totalorder %s2519_s23, 2  ;;  %p55_p5 = scmp.ne.s32.totalorder %s1885_s13, %s1881_s12 }
  0x15   : > { %p2010_p6 = scmp.eq.s32.totalorder %s1527_s20, 0  ;;  %s68_s28 = sadd.s32 1, %s1877_s11 }
  0x16   : > { %s2521_s23 = smov (%p35_p4, %s2519_s23), 0  ;;  %p75_p8 = scmp.ne.s32.totalorder %s1877_s11, %s1873_s10 }
  0x17   : > { %2489 = sst [smem:[#allocation13_spill]] %s2521_s23  ;;  %p2022_p7 = por %p2010_p6, %p55_p5 }
  0x18   : > { %s37_s30 = ssub.s32 %s1905_s18, %s2521_s23  ;;  %p81_p9 = scmp.ne.s32.totalorder %s1873_s10, %s1869_s9 }
  0x19   : > { %s39_s3 = sor.u32 %s38_s25, %s37_s30  ;;  %p66_p10 = scmp.eq.s32.totalorder %s37_s30, 0 }
  0x1a   : > { %p40_p11 = scmp.eq.s32.totalorder %s39_s3, 0  ;;  %p2034_p12 = por %p75_p8, %p50_p2 }
  0x1b   : > { %s2039_s5 = scalar_select %p66_p10, %s1877_s11, %s68_s28  }
  0x1c   : > { %s2042_s6 = scalar_select %p40_p11, %s1889_s14, %s42_s24  }
  0x1d   : > { %p2046_p13 = por %p81_p9, %p2010_p6  ;;  %p107_p0 = scmp.eq.s32.totalorder %s1527_s20, 3 }
  0x1e   : > { %2492 = sst [smem:[#allocation14_spill]] %s2042_s6  ;;  %p113_p4 = scmp.eq.s32.totalorder %s1528_s21, 3 }
  0x1f   : > { %s2493_s7 = scalar_select %p2046_p13, 1, 0 }
  0x20   : > { %p2053_p2 = por %p107_p0, %p49_p1  ;;  %p1635_p8 = scmp.lt.s32.totalorder %s1909_s19, 4 }
  0x21   : > { %p2061_p10 = por %p113_p4, %p55_p5  ;;  %s133_s24 = sand.u32 1, %s1889_s14  }
  0x22   : > { %s2494_s8 = scalar_select %p2053_p2, 1, 0 }
  0x23   : > { %s2495_s9 = scalar_select %p2061_p10, 1, 0 }
  0x24   : > { %s1531_s25 = sshll.u32 %s133_s24, 1  ;;  %s1532_s27 = sshll.u32 %s1905_s18, 1 }
  0x25   : > { %s142_s28 = sadd.s32 %s1901_s17, %s1532_s27  ;;  %s137_s30 = scalar_lea.vmem [#allocation2], %s1531_s25 }
  0x26   : > { %s146_s20 = sshll.u32 %s137_s30, 4  ;;  %s1533_s3 = sshll.u32 %s142_s28, 5  ;;  %s147_s20 = int_to_ptr.vmem [resolvable:$true] %s146_s20 }
  0x27   : > { %s2496_s0 = sld [smem:[#allocation15_spill]]  ;;  %p2073_p1 = pnand %p1635_p8, %p2004_p3 }
  0x28   : > { %p2079_p5 = pnand %p1635_p8, %p2034_p12  ;;  %p1537_p6 = scmp.ge.s32.totalorder %s1909_s19, 1 }
  0x29   : > { %p172_p9 = scmp.lt.s32.totalorder %s1909_s19, 5  ;;  %s134_s25 = scalar_lea.sflag [#allocation3], %s133_s24 }
  0x2a   : > { %p1731_p11 = pneg %p2073_p1  ;;  %s1742_s27 = scalar_lea.vmem %s147_s20, 32 }
  0x2b   : > { %p1743_p0 = scmp.ne.s32.totalorder %s147_s20, %s1742_s27  ;;  %s1911_s23 = smov [#allocation2]  }
  0x2c   : > { %s1747_s26 = sshll.u32 %s1911_s23, 4  ;;  %s1748_s26 = int_to_ptr.vmem [resolvable:$false] %s1747_s26 }
  0x2d   : > { %s144_s22 = scalar_lea.hbm %s2496_s0, %s1533_s3  ;;  %p1745_p4 = pnand %p1743_p0, %p1731_p11 }
  0x2e   : > { %s1749_s28 = scalar_lea.vmem %s1748_s26, 64  ;;  %p1750_p3 = scmp.lt.s32.totalorder %s147_s20, %s1748_s26 }
  0x2f   : > { %p1746_p10 = pneg %p1745_p4  ;;  %p1751_p2 = scmp.lt.s32.totalorder %s1749_s28, %s1742_s27 }
  0x31   : > { %p1752_p13 = por %p1751_p2, %p1750_p3 }
  0x33   : > { %p1753_p12 = pnand %p1752_p13, %p1746_p10 }
  0x35   : > { %1756 = shalt.err (!%p1753_p12)
}
  0x36   : > { %1627 = dma.hbm_to_vmem [thread:$0]  (!%p2073_p1), %s144_s22, 32, %s147_s20, %s134_s25  }
  0x37   : > { %p2093_p8 = pnand %p1537_p6, %p172_p9  ;;  %s153_s24 = sand.u32 1, %s1877_s11  }
  0x38   : > { %s1547_s30 = sshll.u32 %s1905_s18, 8  ;;  %s1534_s3 = sshll.u32 %s153_s24, 4 }
  0x39   : > { %s163_s23 = scalar_lea.hbm %s2477_s1, %s1547_s30  ;;  %s157_s6 = scalar_lea.vmem [#allocation5], %s1534_s3 }
  0x3a   : > { %s164_s26 = sshll.u32 %s157_s6, 4  ;;  %s154_s28 = scalar_lea.sflag [#allocation6], %s153_s24  ;;  %s165_s26 = int_to_ptr.vmem [resolvable:$true] %s164_s26 }
  0x3b   : > { %p1759_p13 = pneg %p2079_p5  ;;  %s1770_s22 = scalar_lea.vmem %s165_s26, 256 }
  0x3c   : > { %p1771_p2 = scmp.ne.s32.totalorder %s165_s26, %s1770_s22  ;;  %s1912_s20 = smov [#allocation5]  }
  0x3d   : > { %s1775_s25 = sshll.u32 %s1912_s20, 4  ;;  %s1776_s25 = int_to_ptr.vmem [resolvable:$false] %s1775_s25 }
  0x3e   : > { %p1773_p10 = pnand %p1771_p2, %p1759_p13  ;;  %s1777_s0 = scalar_lea.vmem %s1776_s25, 512 }
  0x3f   : > { %p1778_p6 = scmp.lt.s32.totalorder %s165_s26, %s1776_s25  ;;  %p1779_p9 = scmp.lt.s32.totalorder %s1777_s0, %s1770_s22 }
  0x40   : > { %p1774_p1 = pneg %p1773_p10 }
  0x41   : > { %p1780_p11 = por %p1779_p9, %p1778_p6 }
  0x43   : > { %p1781_p0 = pnand %p1780_p11, %p1774_p1 }
  0x45   : > { %1784 = shalt.err (!%p1781_p0)
}
  0x46   : > { %s1913_s30 = smov 128   ;;  %s1914_s3 = smov 8  }
  0x47   : > { %1630 = dma.hbm_to_vmem [thread:$0]  (!%p2079_p5), %s163_s23, 256, %s165_s26, %s154_s28, %s1913_s30, %s1913_s30, %s1914_s3  }
  0x48   : > { %176 = sbr.rel (%p2093_p8) target bundleno = 567 (0x237), region = 28  ;;  %s2109_s24 = sand.u32 (!%p2093_p8), 1, %s1885_s13  }
  0x49   : > { %s1538_s21 = sshll.u32 (!%p2093_p8), %s2109_s24, 1  ;;  %s179_s27 = scalar_lea.sflag (!%p2093_p8), [#allocation3], %s2109_s24 }
  0x4a   : > { %s182_s0 = scalar_lea.vmem (!%p2093_p8), [#allocation2], %s1538_s21 }
  0x4d   : > { %1856 = dma.done.wait (%p2022_p7), %s179_s27, 32  }
  0x4e   : > { %1858 = vsyncadd (%p2022_p7), %s179_s27, 4294967264  ;;  %s187_s14 = sand.u32 1, %s1873_s10   ;;  %p2500_p5 = scmp.ne.s32.totalorder %s2493_s7, 0 }
  0x4f   : > { %s2118_s23 = sshll.u32 %s187_s14, 4  ;;  %s188_s4 = scalar_lea.sflag [#allocation6], %s187_s14 }
  0x50   : > { %s191_s6 = scalar_lea.vmem [#allocation5], %s2118_s23 }
  0x51   : > { %1860 = dma.done.wait (%p2500_p5), %s188_s4, 256  }
  0x52   : > { %1862 = vsyncadd (%p2500_p5), %s188_s4, 4294967040  ;;  %v221_v0 = vlaneseq  ;;  %v217_v14 = vld [vmem:[%s182_s0] sm:$0x3]  ;;  %s1540_s29 = sshll.u32 %s2109_s24, 2  ;;  %s1543_s7 = sshll.u32 %s1897_s16, 1 }
  0x53   : > { %v218_v19 = vmax.f32 %v217_v14, 0.0  ;;  %s1415_s26 = sadd.s32 %s1893_s15, %s1543_s7  ;;  %s216_s22 = scalar_lea.vmem [#allocation7], %s1540_s29 }
  0x54   : > { %v2125_v1 = vshrl.u32 %v221_v0, 7  ;;  %s1544_s28 = sshll.u32 %s1415_s26, 6  ;;  %s1419_s20 = sshll.u32 %s216_s22, 4  ;;  %s1420_s20 = int_to_ptr.vmem [resolvable:$true] %s1419_s20 }
  0x55   : > { %v219_v27 = vmin.f32 %v218_v19, 17.0  ;;  %s1417_s3 = scalar_lea.hbm %s2478_s2, %s1544_s28  ;;  %s1404_s21 = scalar_lea.sflag [#allocation4], %s2109_s24 }
  0x56   : > { %v448_v2 = vsub.s32 1, %v2125_v1  ;;  %v580_v3 = vsub.s32 0, %v2125_v1  ;;  %v253_v4 = vadd.s32 248, %v2125_v1  ;;  %v237_v5 = vadd.s32 120, %v2125_v1  ;;  %s1785_s27 = scalar_lea.vmem %s1420_s20, 64  ;;  %p2501_p4 = scmp.ne.s32.totalorder %s2494_s8, 0 }
  0x57   : > { %v252_v6 = vadd.s32 240, %v2125_v1  ;;  %v2133_v7 = vadd.s32 112, %v2125_v1  ;;  %v2136_v8 = vadd.s32 232, %v2125_v1  ;;  %v2139_v9 = vadd.s32 104, %v2125_v1  ;;  %p1786_p7 = scmp.ne.s32.totalorder %s1420_s20, %s1785_s27  ;;  %s1915_s15 = smov [#allocation7]  }
  0x58   : > { %v285_v10 = vcvt.s32.f32 %v253_v4  ;;  %v269_v11 = vcvt.s32.f32 %v237_v5  ;;  %v775_v12 = vadd.s32 256, %v253_v4  ;;  %v2141_v13 = vadd.s32 256, %v237_v5  ;;  %s1789_s16 = sshll.u32 %s1915_s15, 4  ;;  %s1790_s16 = int_to_ptr.vmem [resolvable:$false] %s1789_s16 }
  0x59   : > { %v284_v15 = vcvt.s32.f32 %v252_v6  ;;  %v268_v16 = vcvt.s32.f32 %v2133_v7  ;;  %v2144_v17 = vadd.s32 256, %v252_v6  ;;  %v283_v18 = vcvt.s32.f32 %v2136_v8  ;;  %p1787_p3 = pnand %p1786_p7, %p2501_p4  ;;  %s1791_s0 = scalar_lea.vmem %s1790_s16, 128 }
  0x5a   : > { %v317_v20 = vadd.f32 0.5, %v285_v10  ;;  %v301_v21 = vadd.f32 0.5, %v269_v11  ;;  %v807_v22 = vcvt.s32.f32 %v775_v12  ;;  %v791_v24 = vcvt.s32.f32 %v2141_v13  ;;  %p1792_p8 = scmp.lt.s32.totalorder %s1420_s20, %s1790_s16  ;;  %p1793_p13 = scmp.lt.s32.totalorder %s1791_s0, %s1785_s27 }
  0x5b   : > { %v316_v23 = vadd.f32 0.5, %v284_v15  ;;  %v300_v25 = vadd.f32 0.5, %v268_v16  ;;  %v806_v26 = vcvt.s32.f32 %v2144_v17  ;;  %v2155_v35 = vrot.slane %v219_v27, %v448_v2  ;;  %p1788_p12 = pneg %p1787_p3 }
  0x5c   : > { %v349_v28 = vmul.f32 0.055555556, %v317_v20  ;;  %v333_v29 = vmul.f32 0.055555556, %v301_v21  ;;  %v839_v30 = vadd.f32 0.5, %v807_v22  ;;  %v823_v32 = vadd.f32 0.5, %v791_v24  ;;  %p1794_p2 = por %p1793_p13, %p1792_p8 }
  0x5d   : > { %v348_v31 = vmul.f32 0.055555556, %v316_v23  ;;  %v332_v33 = vmul.f32 0.055555556, %v300_v25  ;;  %v2153_v34 = vadd.f32 0.5, %v806_v26  ;;  %v2157_v36 = vrot.slane %v219_v27, %v580_v3 }
  0x5e   : > { %v381_v37 = vfloor.f32 %v349_v28  ;;  %v365_v38 = vfloor.f32 %v333_v29  ;;  %v871_v39 = vmul.f32 0.055555556, %v839_v30  ;;  %v855_v41 = vmul.f32 0.055555556, %v823_v32  ;;  %p1795_p10 = pnand %p1794_p2, %p1788_p12 }
  0x5f   : > { %v380_v40 = vfloor.f32 %v348_v31  ;;  %v364_v42 = vfloor.f32 %v332_v33 }
  0x60   : > { %v413_v43 = vmul.f32 18.0, %v381_v37  ;;  %v481_v44 = vsub.f32 %v381_v37, %v2155_v35  ;;  %v397_v45 = vmul.f32 18.0, %v365_v38  ;;  %v465_v46 = vsub.f32 %v365_v38, %v2155_v35 }
  0x61   : > { %v903_v47 = vfloor.f32 %v871_v39  ;;  %v412_v48 = vmul.f32 18.0, %v380_v40  ;;  %v480_v49 = vsub.f32 %v380_v40, %v2155_v35  ;;  %v887_v50 = vfloor.f32 %v855_v41 }
  0x62   : > { %v445_v51 = vsub.f32 %v285_v10, %v413_v43  ;;  %v513_v52 = vand.u32 2147483647, %v481_v44  ;;  %v429_v53 = vsub.f32 %v269_v11, %v397_v45  ;;  %v497_v54 = vand.u32 2147483647, %v465_v46 }
  0x63   : > { %v935_v55 = vmul.f32 18.0, %v903_v47  ;;  %v999_v56 = vsub.f32 %v903_v47, %v2155_v35  ;;  %v444_v57 = vsub.f32 %v284_v15, %v412_v48  ;;  %v512_v58 = vand.u32 2147483647, %v480_v49 }
  0x64   : > { %v545_v59 = vsub.f32 1.0, %v513_v52  ;;  %v613_v60 = vsub.f32 %v445_v51, %v2157_v36  ;;  %v529_v61 = vsub.f32 1.0, %v497_v54  ;;  %v597_v62 = vsub.f32 %v429_v53, %v2157_v36 }
  0x65   : > { %v967_v63 = vsub.f32 %v807_v22, %v935_v55  ;;  %v1031_v0 = vand.u32 2147483647, %v999_v56  ;;  %v544_v2 = vsub.f32 1.0, %v512_v58  ;;  %v612_v3 = vsub.f32 %v444_v57, %v2157_v36 }
  0x66   : > { %v577_v4 = vmax.f32 %v545_v59, 0.0  ;;  %v645_v5 = vand.u32 2147483647, %v613_v60  ;;  %v561_v6 = vmax.f32 %v529_v61, 0.0  ;;  %v629_v10 = vand.u32 2147483647, %v597_v62 }
  0x67   : > { %v1063_v11 = vsub.f32 1.0, %v1031_v0  ;;  %v1127_v12 = vsub.f32 %v967_v63, %v2157_v36  ;;  %v576_v13 = vmax.f32 %v544_v2, 0.0  ;;  %v644_v14 = vand.u32 2147483647, %v612_v3 }
  0x68   : > { %v677_v15 = vsub.f32 1.0, %v645_v5  ;;  %v661_v19 = vsub.f32 1.0, %v629_v10  ;;  %v919_v20 = vmul.f32 18.0, %v887_v50  ;;  %v983_v21 = vsub.f32 %v887_v50, %v2155_v35 }
  0x69   : > { %v1095_v23 = vmax.f32 %v1063_v11, 0.0  ;;  %v1159_v22 = vand.u32 2147483647, %v1127_v12  ;;  %v676_v25 = vsub.f32 1.0, %v644_v14  ;;  %v396_v27 = vmul.f32 18.0, %v364_v42 }
  0x6a   : > { %v709_v28 = vmax.f32 %v677_v15, 0.0  ;;  %v693_v29 = vmax.f32 %v661_v19, 0.0  ;;  %v951_v30 = vsub.f32 %v791_v24, %v919_v20  ;;  %v1015_v31 = vand.u32 2147483647, %v983_v21 }
  0x6b   : > { %v1191_v32 = vsub.f32 1.0, %v1159_v22  ;;  %v708_v33 = vmax.f32 %v676_v25, 0.0  ;;  %v428_v37 = vsub.f32 %v268_v16, %v396_v27  ;;  %v464_v38 = vsub.f32 %v364_v42, %v2155_v35 }
  0x6c   : > { %v741_v39 = vmul.f32 %v709_v28, %v577_v4  ;;  %v725_v40 = vmul.f32 %v693_v29, %v561_v6  ;;  %v1047_v41 = vsub.f32 1.0, %v1015_v31  ;;  %v1111_v43 = vsub.f32 %v951_v30, %v2157_v36 }
  0x6d   : > { %v1223_v44 = vmax.f32 %v1191_v32, 0.0  ;;  %v740_v45 = vmul.f32 %v708_v33, %v576_v13  ;;  %v496_v46 = vand.u32 2147483647, %v464_v38  ;;  %v596_v47 = vsub.f32 %v428_v37, %v2157_v36 }
  0x6e   : > { %1583 = vmatprep.subr.mxu1 %v741_v39  ;;  %v1079_v24 = vmax.f32 %v1047_v41, 0.0  ;;  %v1143_v48 = vand.u32 2147483647, %v1111_v43  ;;  %v870_v49 = vmul.f32 0.055555556, %v2153_v34  ;;  %v315_v16 = vadd.f32 0.5, %v283_v18 }
  0x6f   : > { %1584 = vmatpush3.msra.mxu1 %v725_v40  ;;  %v1255_v42 = vmul.f32 %v1223_v44, %v1095_v23  ;;  %v528_v50 = vsub.f32 1.0, %v496_v46  ;;  %v628_v51 = vand.u32 2147483647, %v596_v47  ;;  %v758_v52 = vadd.s32 256, %v2133_v7 }
  0x70   : > { %1585 = vmatprep.subr.mxu1 %v740_v45  ;;  %v1175_v53 = vsub.f32 1.0, %v1143_v48  ;;  %v902_v54 = vfloor.f32 %v870_v49  ;;  %v347_v55 = vmul.f32 0.055555556, %v315_v16  ;;  %v267_v56 = vcvt.s32.f32 %v2139_v9 }
  0x71   : > { %1548 = vmatprep.subr.mxu0 %v1255_v42  ;;  %v560_v57 = vmax.f32 %v528_v50, 0.0  ;;  %v660_v58 = vsub.f32 1.0, %v628_v51  ;;  %v790_v59 = vcvt.s32.f32 %v758_v52  ;;  %v773_v34 = vadd.s32 256, %v2136_v8 }
  0x72   : > { %v1207_v60 = vmax.f32 %v1175_v53, 0.0  ;;  %v934_v61 = vmul.f32 18.0, %v902_v54  ;;  %v998_v62 = vsub.f32 %v902_v54, %v2155_v35  ;;  %v379_v63 = vfloor.f32 %v347_v55 }
  0x73   : > { %v692_v0 = vmax.f32 %v660_v58, 0.0  ;;  %v822_v2 = vadd.f32 0.5, %v790_v59  ;;  %v299_v7 = vadd.f32 0.5, %v267_v56  ;;  %v805_v3 = vcvt.s32.f32 %v773_v34 }
  0x74   : > { %v1239_v4 = vmul.f32 %v1207_v60, %v1079_v24  ;;  %v966_v5 = vsub.f32 %v806_v26, %v934_v61  ;;  %v1030_v6 = vand.u32 2147483647, %v998_v62  ;;  %v411_v10 = vmul.f32 18.0, %v379_v63 }
  0x75   : > { %v724_v11 = vmul.f32 %v692_v0, %v560_v57  ;;  %v479_v12 = vsub.f32 %v379_v63, %v2155_v35  ;;  %v854_v13 = vmul.f32 0.055555556, %v822_v2  ;;  %v331_v14 = vmul.f32 0.055555556, %v299_v7 }
  0x76   : > { %1549 = vmatpush3.msra.mxu0 %v1239_v4  ;;  %v1062_v15 = vsub.f32 1.0, %v1030_v6  ;;  %v1126_v19 = vsub.f32 %v966_v5, %v2157_v36  ;;  %v443_v20 = vsub.f32 %v283_v18, %v411_v10  ;;  %v837_v21 = vadd.f32 0.5, %v805_v3 }
  0x77   : > { %1586 = vmatpush3.msra.mxu1 %v724_v11  ;;  %v511_v23 = vand.u32 2147483647, %v479_v12  ;;  %v886_v22 = vfloor.f32 %v854_v13  ;;  %v363_v17 = vfloor.f32 %v331_v14  ;;  %v2187_v26 = vadd.s32 224, %v2125_v1 }
  0x78   : > { %v1094_v25 = vmax.f32 %v1062_v15, 0.0  ;;  %v1158_v27 = vand.u32 2147483647, %v1126_v19  ;;  %v611_v28 = vsub.f32 %v443_v20, %v2157_v36  ;;  %v869_v29 = vmul.f32 0.055555556, %v837_v21 }
  0x79   : > { %v543_v30 = vsub.f32 1.0, %v511_v23  ;;  %v918_v31 = vmul.f32 18.0, %v886_v22  ;;  %v982_v32 = vsub.f32 %v886_v22, %v2155_v35  ;;  %v395_v33 = vmul.f32 18.0, %v363_v17 }
  0x7a   : > { %v1190_v8 = vsub.f32 1.0, %v1158_v27  ;;  %v643_v18 = vand.u32 2147483647, %v611_v28  ;;  %v463_v37 = vsub.f32 %v363_v17, %v2155_v35  ;;  %v901_v38 = vfloor.f32 %v869_v29 }
  0x7b   : > { %v575_v39 = vmax.f32 %v543_v30, 0.0  ;;  %v950_v40 = vsub.f32 %v790_v59, %v918_v31  ;;  %v1014_v41 = vand.u32 2147483647, %v982_v32  ;;  %v427_v43 = vsub.f32 %v267_v56, %v395_v33 }
  0x7c   : > { %v1222_v44 = vmax.f32 %v1190_v8, 0.0  ;;  %v675_v45 = vsub.f32 1.0, %v643_v18  ;;  %v495_v46 = vand.u32 2147483647, %v463_v37  ;;  %v933_v47 = vmul.f32 18.0, %v901_v38 }
  0x7d   : > { %v1046_v24 = vsub.f32 1.0, %v1014_v41  ;;  %v1110_v48 = vsub.f32 %v950_v40, %v2157_v36  ;;  %v595_v49 = vsub.f32 %v427_v43, %v2157_v36  ;;  %v997_v16 = vsub.f32 %v901_v38, %v2155_v35 }
  0x7e   : > { %v1254_v42 = vmul.f32 %v1222_v44, %v1094_v25  ;;  %v707_v50 = vmax.f32 %v675_v45, 0.0  ;;  %v527_v51 = vsub.f32 1.0, %v495_v46  ;;  %v965_v52 = vsub.f32 %v805_v3, %v933_v47 }
  0x7f   : > { %v1078_v53 = vmax.f32 %v1046_v24, 0.0  ;;  %v1142_v54 = vand.u32 2147483647, %v1110_v48  ;;  %v627_v55 = vand.u32 2147483647, %v595_v49  ;;  %v282_v56 = vcvt.s32.f32 %v2187_v26 }
  0x80   : > { %1550 = vmatprep.subr.mxu0 %v1254_v42  ;;  %v739_v57 = vmul.f32 %v707_v50, %v575_v39  ;;  %v559_v58 = vmax.f32 %v527_v51, 0.0  ;;  %v1029_v59 = vand.u32 2147483647, %v997_v16  ;;  %v1125_v34 = vsub.f32 %v965_v52, %v2157_v36 }
  0x81   : > { %v1174_v60 = vsub.f32 1.0, %v1142_v54  ;;  %v659_v61 = vsub.f32 1.0, %v627_v55  ;;  %v314_v62 = vadd.f32 0.5, %v282_v56  ;;  %v757_v63 = vadd.s32 256, %v2139_v9 }
  0x82   : > { %1587 = vmatprep.subr.mxu1 %v739_v57  ;;  %v1061_v0 = vsub.f32 1.0, %v1029_v59  ;;  %v1157_v2 = vand.u32 2147483647, %v1125_v34  ;;  %v234_v7 = vadd.s32 96, %v2125_v1  ;;  %v772_v3 = vadd.s32 256, %v2187_v26 }
  0x83   : > { %v1206_v4 = vmax.f32 %v1174_v60, 0.0  ;;  %v691_v5 = vmax.f32 %v659_v61, 0.0  ;;  %v346_v6 = vmul.f32 0.055555556, %v314_v62  ;;  %v789_v10 = vcvt.s32.f32 %v757_v63 }
  0x84   : > { %v1093_v11 = vmax.f32 %v1061_v0, 0.0  ;;  %v1189_v12 = vsub.f32 1.0, %v1157_v2  ;;  %v266_v13 = vcvt.s32.f32 %v234_v7  ;;  %v804_v14 = vcvt.s32.f32 %v772_v3 }
  0x85   : > { %v1238_v15 = vmul.f32 %v1206_v4, %v1078_v53  ;;  %v723_v19 = vmul.f32 %v691_v5, %v559_v58  ;;  %v378_v20 = vfloor.f32 %v346_v6  ;;  %v821_v21 = vadd.f32 0.5, %v789_v10 }
  0x86   : > { %v1221_v9 = vmax.f32 %v1189_v12, 0.0  ;;  %v298_v23 = vadd.f32 0.5, %v266_v13  ;;  %v836_v22 = vadd.f32 0.5, %v804_v14  ;;  %v2201_v17 = vadd.s32 216, %v2125_v1 }
  0x87   : > { %1551 = vmatpush3.msra.mxu0 %v1238_v15  ;;  %1588 = vmatpush3.msra.mxu1 %v723_v19  ;;  %v410_v26 = vmul.f32 18.0, %v378_v20  ;;  %v478_v25 = vsub.f32 %v378_v20, %v2155_v35  ;;  %v853_v27 = vmul.f32 0.055555556, %v821_v21  ;;  %v2204_v28 = vadd.s32 256, %v234_v7 }
  0x88   : > { %v1253_v29 = vmul.f32 %v1221_v9, %v1093_v11  ;;  %v330_v30 = vmul.f32 0.055555556, %v298_v23  ;;  %v868_v31 = vmul.f32 0.055555556, %v836_v22  ;;  %v281_v32 = vcvt.s32.f32 %v2201_v17 }
  0x89   : > { %v442_v33 = vsub.f32 %v282_v56, %v410_v26  ;;  %v510_v8 = vand.u32 2147483647, %v478_v25  ;;  %v885_v18 = vfloor.f32 %v853_v27  ;;  %v788_v37 = vcvt.s32.f32 %v2204_v28 }
  0x8a   : > { %1552 = vmatprep.subr.mxu0 %v1253_v29  ;;  %v362_v38 = vfloor.f32 %v330_v30  ;;  %v900_v39 = vfloor.f32 %v868_v31  ;;  %v313_v40 = vadd.f32 0.5, %v281_v32  ;;  %v2209_v41 = vadd.s32 88, %v2125_v1 }
  0x8b   : > { %v542_v43 = vsub.f32 1.0, %v510_v8  ;;  %v610_v44 = vsub.f32 %v442_v33, %v2157_v36  ;;  %v917_v45 = vmul.f32 18.0, %v885_v18  ;;  %v981_v46 = vsub.f32 %v885_v18, %v2155_v35 }
  0x8c   : > { %v394_v47 = vmul.f32 18.0, %v362_v38  ;;  %v462_v24 = vsub.f32 %v362_v38, %v2155_v35  ;;  %v932_v48 = vmul.f32 18.0, %v900_v39  ;;  %v996_v49 = vsub.f32 %v900_v39, %v2155_v35 }
  0x8d   : > { %v574_v16 = vmax.f32 %v542_v43, 0.0  ;;  %v642_v42 = vand.u32 2147483647, %v610_v44  ;;  %v949_v50 = vsub.f32 %v789_v10, %v917_v45  ;;  %v1013_v51 = vand.u32 2147483647, %v981_v46 }
  0x8e   : > { %v426_v52 = vsub.f32 %v266_v13, %v394_v47  ;;  %v494_v53 = vand.u32 2147483647, %v462_v24  ;;  %v964_v54 = vsub.f32 %v804_v14, %v932_v48  ;;  %v1028_v55 = vand.u32 2147483647, %v996_v49 }
  0x8f   : > { %v674_v56 = vsub.f32 1.0, %v642_v42  ;;  %v1045_v57 = vsub.f32 1.0, %v1013_v51  ;;  %v1109_v58 = vsub.f32 %v949_v50, %v2157_v36  ;;  %v345_v59 = vmul.f32 0.055555556, %v313_v40 }
  0x90   : > { %v526_v34 = vsub.f32 1.0, %v494_v53  ;;  %v594_v60 = vsub.f32 %v426_v52, %v2157_v36  ;;  %v1060_v61 = vsub.f32 1.0, %v1028_v55  ;;  %v1124_v62 = vsub.f32 %v964_v54, %v2157_v36 }
  0x91   : > { %v706_v63 = vmax.f32 %v674_v56, 0.0  ;;  %v1077_v0 = vmax.f32 %v1045_v57, 0.0  ;;  %v1141_v2 = vand.u32 2147483647, %v1109_v58  ;;  %v377_v7 = vfloor.f32 %v345_v59 }
  0x92   : > { %v558_v3 = vmax.f32 %v526_v34, 0.0  ;;  %v626_v4 = vand.u32 2147483647, %v594_v60  ;;  %v1092_v5 = vmax.f32 %v1060_v61, 0.0  ;;  %v1156_v6 = vand.u32 2147483647, %v1124_v62 }
  0x93   : > { %v738_v10 = vmul.f32 %v706_v63, %v574_v16  ;;  %v1173_v11 = vsub.f32 1.0, %v1141_v2  ;;  %v409_v12 = vmul.f32 18.0, %v377_v7  ;;  %v477_v13 = vsub.f32 %v377_v7, %v2155_v35 }
  0x94   : > { %v658_v14 = vsub.f32 1.0, %v626_v4  ;;  %v1188_v15 = vsub.f32 1.0, %v1156_v6  ;;  %v820_v19 = vadd.f32 0.5, %v788_v37  ;;  %v265_v20 = vcvt.s32.f32 %v2209_v41 }
  0x95   : > { %1589 = vmatprep.subr.mxu1 %v738_v10  ;;  %v1205_v21 = vmax.f32 %v1173_v11, 0.0  ;;  %v441_v9 = vsub.f32 %v281_v32, %v409_v12  ;;  %v509_v23 = vand.u32 2147483647, %v477_v13  ;;  %v771_v22 = vadd.s32 256, %v2201_v17 }
  0x96   : > { %v690_v26 = vmax.f32 %v658_v14, 0.0  ;;  %v1220_v25 = vmax.f32 %v1188_v15, 0.0  ;;  %v852_v27 = vmul.f32 0.055555556, %v820_v19  ;;  %v297_v29 = vadd.f32 0.5, %v265_v20 }
  0x97   : > { %v1237_v30 = vmul.f32 %v1205_v21, %v1077_v0  ;;  %v541_v31 = vsub.f32 1.0, %v509_v23  ;;  %v609_v33 = vsub.f32 %v441_v9, %v2157_v36  ;;  %v803_v8 = vcvt.s32.f32 %v771_v22 }
  0x98   : > { %v722_v18 = vmul.f32 %v690_v26, %v558_v3  ;;  %v1252_v38 = vmul.f32 %v1220_v25, %v1092_v5  ;;  %v884_v39 = vfloor.f32 %v852_v27  ;;  %v329_v40 = vmul.f32 0.055555556, %v297_v29 }
  0x99   : > { %1553 = vmatpush3.msra.mxu0 %v1237_v30  ;;  %v573_v43 = vmax.f32 %v541_v31, 0.0  ;;  %v641_v44 = vand.u32 2147483647, %v609_v33  ;;  %v835_v32 = vadd.f32 0.5, %v803_v8  ;;  %v248_v45 = vadd.s32 208, %v2125_v1 }
  0x9a   : > { %1590 = vmatpush3.msra.mxu1 %v722_v18  ;;  %1554 = vmatprep.subr.mxu0 %v1252_v38  ;;  %v916_v17 = vmul.f32 18.0, %v884_v39  ;;  %v980_v46 = vsub.f32 %v884_v39, %v2155_v35  ;;  %v361_v47 = vfloor.f32 %v329_v40  ;;  %v2227_v24 = vadd.s32 256, %v2209_v41 }
  0x9b   : > { %v673_v48 = vsub.f32 1.0, %v641_v44  ;;  %v867_v49 = vmul.f32 0.055555556, %v835_v32  ;;  %v280_v16 = vcvt.s32.f32 %v248_v45  ;;  %v2230_v42 = vadd.s32 80, %v2125_v1 }
  0x9c   : > { %v948_v50 = vsub.f32 %v788_v37, %v916_v17  ;;  %v1012_v51 = vand.u32 2147483647, %v980_v46  ;;  %v393_v52 = vmul.f32 18.0, %v361_v47  ;;  %v461_v53 = vsub.f32 %v361_v47, %v2155_v35 }
  0x9d   : > { %v705_v54 = vmax.f32 %v673_v48, 0.0  ;;  %v899_v55 = vfloor.f32 %v867_v49  ;;  %v312_v56 = vadd.f32 0.5, %v280_v16  ;;  %v787_v57 = vcvt.s32.f32 %v2227_v24 }
  0x9e   : > { %v1044_v41 = vsub.f32 1.0, %v1012_v51  ;;  %v1108_v58 = vsub.f32 %v948_v50, %v2157_v36  ;;  %v425_v59 = vsub.f32 %v265_v20, %v393_v52  ;;  %v493_v34 = vand.u32 2147483647, %v461_v53 }
  0x9f   : > { %v737_v60 = vmul.f32 %v705_v54, %v573_v43  ;;  %v931_v61 = vmul.f32 18.0, %v899_v55  ;;  %v995_v62 = vsub.f32 %v899_v55, %v2155_v35  ;;  %v344_v28 = vmul.f32 0.055555556, %v312_v56 }
  0xa0   : > { %v1076_v37 = vmax.f32 %v1044_v41, 0.0  ;;  %v1140_v63 = vand.u32 2147483647, %v1108_v58  ;;  %v525_v0 = vsub.f32 1.0, %v493_v34  ;;  %v593_v2 = vsub.f32 %v425_v59, %v2157_v36 }
  0xa1   : > { %1591 = vmatprep.subr.mxu1 %v737_v60  ;;  %v963_v7 = vsub.f32 %v803_v8, %v931_v61  ;;  %v1027_v3 = vand.u32 2147483647, %v995_v62  ;;  %v376_v4 = vfloor.f32 %v344_v28  ;;  %v819_v5 = vadd.f32 0.5, %v787_v57 }
  0xa2   : > { %v1172_v6 = vsub.f32 1.0, %v1140_v63  ;;  %v557_v10 = vmax.f32 %v525_v0, 0.0  ;;  %v625_v11 = vand.u32 2147483647, %v593_v2  ;;  %v264_v12 = vcvt.s32.f32 %v2230_v42 }
  0xa3   : > { %v1059_v13 = vsub.f32 1.0, %v1027_v3  ;;  %v1123_v14 = vsub.f32 %v963_v7, %v2157_v36  ;;  %v408_v15 = vmul.f32 18.0, %v376_v4  ;;  %v476_v19 = vsub.f32 %v376_v4, %v2155_v35 }
  0xa4   : > { %v1204_v20 = vmax.f32 %v1172_v6, 0.0  ;;  %v657_v21 = vsub.f32 1.0, %v625_v11  ;;  %v851_v9 = vmul.f32 0.055555556, %v819_v5  ;;  %v296_v23 = vadd.f32 0.5, %v264_v12 }
  0xa5   : > { %v1091_v22 = vmax.f32 %v1059_v13, 0.0  ;;  %v1155_v26 = vand.u32 2147483647, %v1123_v14  ;;  %v440_v25 = vsub.f32 %v280_v16, %v408_v15  ;;  %v508_v27 = vand.u32 2147483647, %v476_v19 }
  0xa6   : > { %v1236_v29 = vmul.f32 %v1204_v20, %v1076_v37  ;;  %v689_v30 = vmax.f32 %v657_v21, 0.0  ;;  %v883_v31 = vfloor.f32 %v851_v9  ;;  %v328_v33 = vmul.f32 0.055555556, %v296_v23 }
  0xa7   : > { %v1187_v8 = vsub.f32 1.0, %v1155_v26  ;;  %v540_v18 = vsub.f32 1.0, %v508_v27  ;;  %v608_v38 = vsub.f32 %v440_v25, %v2157_v36  ;;  %v770_v39 = vadd.s32 256, %v248_v45 }
  0xa8   : > { %1555 = vmatpush3.msra.mxu0 %v1236_v29  ;;  %v721_v40 = vmul.f32 %v689_v30, %v557_v10  ;;  %v915_v43 = vmul.f32 18.0, %v883_v31  ;;  %v979_v44 = vsub.f32 %v883_v31, %v2155_v35  ;;  %v360_v32 = vfloor.f32 %v328_v33 }
  0xa9   : > { %v1219_v17 = vmax.f32 %v1187_v8, 0.0  ;;  %v572_v46 = vmax.f32 %v540_v18, 0.0  ;;  %v640_v47 = vand.u32 2147483647, %v608_v38  ;;  %v802_v24 = vcvt.s32.f32 %v770_v39 }
  0xaa   : > { %1592 = vmatpush3.msra.mxu1 %v721_v40  ;;  %v947_v48 = vsub.f32 %v787_v57, %v915_v43  ;;  %v1011_v49 = vand.u32 2147483647, %v979_v44  ;;  %v392_v16 = vmul.f32 18.0, %v360_v32  ;;  %v460_v50 = vsub.f32 %v360_v32, %v2155_v35 }
  0xab   : > { %v1251_v51 = vmul.f32 %v1219_v17, %v1091_v22  ;;  %v672_v52 = vsub.f32 1.0, %v640_v47  ;;  %v834_v53 = vadd.f32 0.5, %v802_v24  ;;  %v247_v45 = vadd.s32 200, %v2125_v1 }
  0xac   : > { %v1043_v54 = vsub.f32 1.0, %v1011_v49  ;;  %v1107_v55 = vsub.f32 %v947_v48, %v2157_v36  ;;  %v424_v56 = vsub.f32 %v264_v12, %v392_v16  ;;  %v492_v41 = vand.u32 2147483647, %v460_v50 }
  0xad   : > { %1556 = vmatprep.subr.mxu0 %v1251_v51  ;;  %v704_v58 = vmax.f32 %v672_v52, 0.0  ;;  %v866_v59 = vmul.f32 0.055555556, %v834_v53  ;;  %v279_v34 = vcvt.s32.f32 %v247_v45  ;;  %v754_v57 = vadd.s32 256, %v2230_v42 }
  0xae   : > { %v1075_v60 = vmax.f32 %v1043_v54, 0.0  ;;  %v1139_v61 = vand.u32 2147483647, %v1107_v55  ;;  %v524_v62 = vsub.f32 1.0, %v492_v41  ;;  %v592_v28 = vsub.f32 %v424_v56, %v2157_v36 }
  0xaf   : > { %v736_v37 = vmul.f32 %v704_v58, %v572_v46  ;;  %v898_v63 = vfloor.f32 %v866_v59  ;;  %v311_v0 = vadd.f32 0.5, %v279_v34  ;;  %v786_v2 = vcvt.s32.f32 %v754_v57 }
  0xb0   : > { %v1171_v7 = vsub.f32 1.0, %v1139_v61  ;;  %v556_v3 = vmax.f32 %v524_v62, 0.0  ;;  %v624_v4 = vand.u32 2147483647, %v592_v28  ;;  %v2250_v5 = vadd.s32 72, %v2125_v1 }
  0xb1   : > { %1593 = vmatprep.subr.mxu1 %v736_v37  ;;  %v930_v6 = vmul.f32 18.0, %v898_v63  ;;  %v994_v10 = vsub.f32 %v898_v63, %v2155_v35  ;;  %v343_v42 = vmul.f32 0.055555556, %v311_v0  ;;  %v818_v11 = vadd.f32 0.5, %v786_v2 }
  0xb2   : > { %v1203_v12 = vmax.f32 %v1171_v7, 0.0  ;;  %v656_v13 = vsub.f32 1.0, %v624_v4  ;;  %v263_v14 = vcvt.s32.f32 %v2250_v5  ;;  %v769_v15 = vadd.s32 256, %v247_v45 }
  0xb3   : > { %v962_v19 = vsub.f32 %v802_v24, %v930_v6  ;;  %v1026_v20 = vand.u32 2147483647, %v994_v10  ;;  %v375_v21 = vfloor.f32 %v343_v42  ;;  %v850_v9 = vmul.f32 0.055555556, %v818_v11 }
  0xb4   : > { %v1235_v23 = vmul.f32 %v1203_v12, %v1075_v60  ;;  %v688_v22 = vmax.f32 %v656_v13, 0.0  ;;  %v295_v26 = vadd.f32 0.5, %v263_v14  ;;  %v801_v25 = vcvt.s32.f32 %v769_v15 }
  0xb5   : > { %v1058_v27 = vsub.f32 1.0, %v1026_v20  ;;  %v1122_v29 = vsub.f32 %v962_v19, %v2157_v36  ;;  %v407_v30 = vmul.f32 18.0, %v375_v21  ;;  %v475_v31 = vsub.f32 %v375_v21, %v2155_v35 }
  0xb6   : > { %1557 = vmatpush3.msra.mxu0 %v1235_v23  ;;  %v720_v33 = vmul.f32 %v688_v22, %v556_v3  ;;  %v882_v8 = vfloor.f32 %v850_v9  ;;  %v327_v18 = vmul.f32 0.055555556, %v295_v26  ;;  %v833_v38 = vadd.f32 0.5, %v801_v25 }
  0xb7   : > { %v1090_v39 = vmax.f32 %v1058_v27, 0.0  ;;  %v1154_v40 = vand.u32 2147483647, %v1122_v29  ;;  %v439_v43 = vsub.f32 %v279_v34, %v407_v30  ;;  %v507_v44 = vand.u32 2147483647, %v475_v31 }
  0xb8   : > { %1594 = vmatpush3.msra.mxu1 %v720_v33  ;;  %v914_v32 = vmul.f32 18.0, %v882_v8  ;;  %v978_v17 = vsub.f32 %v882_v8, %v2155_v35  ;;  %v359_v46 = vfloor.f32 %v327_v18  ;;  %v865_v47 = vmul.f32 0.055555556, %v833_v38 }
  0xb9   : > { %v1186_v24 = vsub.f32 1.0, %v1154_v40  ;;  %v539_v48 = vsub.f32 1.0, %v507_v44  ;;  %v607_v49 = vsub.f32 %v439_v43, %v2157_v36  ;;  %v2259_v16 = vadd.s32 192, %v2125_v1 }
  0xba   : > { %v946_v50 = vsub.f32 %v786_v2, %v914_v32  ;;  %v1010_v51 = vand.u32 2147483647, %v978_v17  ;;  %v391_v52 = vmul.f32 18.0, %v359_v46  ;;  %v459_v53 = vsub.f32 %v359_v46, %v2155_v35 }
  0xbb   : > { %v1218_v45 = vmax.f32 %v1186_v24, 0.0  ;;  %v571_v54 = vmax.f32 %v539_v48, 0.0  ;;  %v639_v55 = vand.u32 2147483647, %v607_v49  ;;  %v897_v56 = vfloor.f32 %v865_v47 }
  0xbc   : > { %v1042_v41 = vsub.f32 1.0, %v1010_v51  ;;  %v1106_v58 = vsub.f32 %v946_v50, %v2157_v36  ;;  %v423_v59 = vsub.f32 %v263_v14, %v391_v52  ;;  %v491_v34 = vand.u32 2147483647, %v459_v53 }
  0xbd   : > { %v1250_v57 = vmul.f32 %v1218_v45, %v1090_v39  ;;  %v671_v60 = vsub.f32 1.0, %v639_v55  ;;  %v929_v61 = vmul.f32 18.0, %v897_v56  ;;  %v993_v62 = vsub.f32 %v897_v56, %v2155_v35 }
  0xbe   : > { %v1074_v28 = vmax.f32 %v1042_v41, 0.0  ;;  %v1138_v37 = vand.u32 2147483647, %v1106_v58  ;;  %v523_v63 = vsub.f32 1.0, %v491_v34  ;;  %v591_v0 = vsub.f32 %v423_v59, %v2157_v36 }
  0xbf   : > { %1558 = vmatprep.subr.mxu0 %v1250_v57  ;;  %v703_v2 = vmax.f32 %v671_v60, 0.0  ;;  %v961_v7 = vsub.f32 %v801_v25, %v929_v61  ;;  %v1025_v3 = vand.u32 2147483647, %v993_v62  ;;  %v278_v4 = vcvt.s32.f32 %v2259_v16 }
  0xc0   : > { %v1170_v6 = vsub.f32 1.0, %v1138_v37  ;;  %v555_v10 = vmax.f32 %v523_v63, 0.0  ;;  %v623_v42 = vand.u32 2147483647, %v591_v0  ;;  %v753_v11 = vadd.s32 256, %v2250_v5 }
  0xc1   : > { %v735_v12 = vmul.f32 %v703_v2, %v571_v54  ;;  %v1057_v13 = vsub.f32 1.0, %v1025_v3  ;;  %v1121_v14 = vsub.f32 %v961_v7, %v2157_v36  ;;  %v310_v15 = vadd.f32 0.5, %v278_v4 }
  0xc2   : > { %v1202_v19 = vmax.f32 %v1170_v6, 0.0  ;;  %v655_v20 = vsub.f32 1.0, %v623_v42  ;;  %v785_v21 = vcvt.s32.f32 %v753_v11  ;;  %v230_v9 = vadd.s32 64, %v2125_v1 }
  0xc3   : > { %1595 = vmatprep.subr.mxu1 %v735_v12  ;;  %v1089_v23 = vmax.f32 %v1057_v13, 0.0  ;;  %v1153_v22 = vand.u32 2147483647, %v1121_v14  ;;  %v342_v26 = vmul.f32 0.055555556, %v310_v15  ;;  %v768_v25 = vadd.s32 256, %v2259_v16 }
  0xc4   : > { %v1234_v27 = vmul.f32 %v1202_v19, %v1074_v28  ;;  %v687_v29 = vmax.f32 %v655_v20, 0.0  ;;  %v817_v30 = vadd.f32 0.5, %v785_v21  ;;  %v262_v5 = vcvt.s32.f32 %v230_v9 }
  0xc5   : > { %v1185_v31 = vsub.f32 1.0, %v1153_v22  ;;  %v374_v33 = vfloor.f32 %v342_v26  ;;  %v800_v8 = vcvt.s32.f32 %v768_v25  ;;  %v2271_v18 = vadd.s32 184, %v2125_v1 }
  0xc6   : > { %1559 = vmatpush3.msra.mxu0 %v1234_v27  ;;  %v719_v38 = vmul.f32 %v687_v29, %v555_v10  ;;  %v849_v39 = vmul.f32 0.055555556, %v817_v30  ;;  %v294_v40 = vadd.f32 0.5, %v262_v5  ;;  %v2273_v43 = vadd.s32 256, %v230_v9 }
  0xc7   : > { %v1217_v44 = vmax.f32 %v1185_v31, 0.0  ;;  %v406_v32 = vmul.f32 18.0, %v374_v33  ;;  %v474_v17 = vsub.f32 %v374_v33, %v2155_v35  ;;  %v832_v46 = vadd.f32 0.5, %v800_v8 }
  0xc8   : > { %1596 = vmatpush3.msra.mxu1 %v719_v38  ;;  %v881_v47 = vfloor.f32 %v849_v39  ;;  %v326_v24 = vmul.f32 0.055555556, %v294_v40  ;;  %v277_v48 = vcvt.s32.f32 %v2271_v18  ;;  %v784_v49 = vcvt.s32.f32 %v2273_v43 }
  0xc9   : > { %v1249_v16 = vmul.f32 %v1217_v44, %v1089_v23  ;;  %v438_v50 = vsub.f32 %v278_v4, %v406_v32  ;;  %v506_v51 = vand.u32 2147483647, %v474_v17  ;;  %v864_v52 = vmul.f32 0.055555556, %v832_v46 }
  0xca   : > { %v913_v53 = vmul.f32 18.0, %v881_v47  ;;  %v977_v45 = vsub.f32 %v881_v47, %v2155_v35  ;;  %v358_v54 = vfloor.f32 %v326_v24  ;;  %v309_v55 = vadd.f32 0.5, %v277_v48 }
  0xcb   : > { %1560 = vmatprep.subr.mxu0 %v1249_v16  ;;  %v538_v56 = vsub.f32 1.0, %v506_v51  ;;  %v606_v41 = vsub.f32 %v438_v50, %v2157_v36  ;;  %v896_v58 = vfloor.f32 %v864_v52  ;;  %v816_v59 = vadd.f32 0.5, %v784_v49 }
  0xcc   : > { %v945_v34 = vsub.f32 %v785_v21, %v913_v53  ;;  %v1009_v57 = vand.u32 2147483647, %v977_v45  ;;  %v390_v60 = vmul.f32 18.0, %v358_v54  ;;  %v458_v61 = vsub.f32 %v358_v54, %v2155_v35 }
  0xcd   : > { %v570_v62 = vmax.f32 %v538_v56, 0.0  ;;  %v638_v28 = vand.u32 2147483647, %v606_v41  ;;  %v928_v37 = vmul.f32 18.0, %v896_v58  ;;  %v992_v63 = vsub.f32 %v896_v58, %v2155_v35 }
  0xce   : > { %v1041_v0 = vsub.f32 1.0, %v1009_v57  ;;  %v1105_v2 = vsub.f32 %v945_v34, %v2157_v36  ;;  %v422_v7 = vsub.f32 %v262_v5, %v390_v60  ;;  %v490_v3 = vand.u32 2147483647, %v458_v61 }
  0xcf   : > { %v670_v4 = vsub.f32 1.0, %v638_v28  ;;  %v960_v6 = vsub.f32 %v800_v8, %v928_v37  ;;  %v1024_v10 = vand.u32 2147483647, %v992_v63  ;;  %v341_v42 = vmul.f32 0.055555556, %v309_v55 }
  0xd0   : > { %v1073_v11 = vmax.f32 %v1041_v0, 0.0  ;;  %v1137_v12 = vand.u32 2147483647, %v1105_v2  ;;  %v522_v13 = vsub.f32 1.0, %v490_v3  ;;  %v590_v14 = vsub.f32 %v422_v7, %v2157_v36 }
  0xd1   : > { %v702_v15 = vmax.f32 %v670_v4, 0.0  ;;  %v1056_v19 = vsub.f32 1.0, %v1024_v10  ;;  %v1120_v20 = vsub.f32 %v960_v6, %v2157_v36  ;;  %v373_v21 = vfloor.f32 %v341_v42 }
  0xd2   : > { %v1169_v9 = vsub.f32 1.0, %v1137_v12  ;;  %v554_v23 = vmax.f32 %v522_v13, 0.0  ;;  %v622_v22 = vand.u32 2147483647, %v590_v14  ;;  %v848_v26 = vmul.f32 0.055555556, %v816_v59 }
  0xd3   : > { %v734_v25 = vmul.f32 %v702_v15, %v570_v62  ;;  %v1088_v27 = vmax.f32 %v1056_v19, 0.0  ;;  %v1152_v29 = vand.u32 2147483647, %v1120_v20  ;;  %v405_v30 = vmul.f32 18.0, %v373_v21 }
  0xd4   : > { %v1201_v5 = vmax.f32 %v1169_v9, 0.0  ;;  %v654_v31 = vsub.f32 1.0, %v622_v22  ;;  %v473_v33 = vsub.f32 %v373_v21, %v2155_v35  ;;  %v880_v8 = vfloor.f32 %v848_v26 }
  0xd5   : > { %1597 = vmatprep.subr.mxu1 %v734_v25  ;;  %v1184_v38 = vsub.f32 1.0, %v1152_v29  ;;  %v437_v39 = vsub.f32 %v277_v48, %v405_v30  ;;  %v229_v40 = vadd.s32 56, %v2125_v1  ;;  %v767_v44 = vadd.s32 256, %v2271_v18 }
  0xd6   : > { %v1233_v32 = vmul.f32 %v1201_v5, %v1073_v11  ;;  %v686_v17 = vmax.f32 %v654_v31, 0.0  ;;  %v505_v46 = vand.u32 2147483647, %v473_v33  ;;  %v912_v47 = vmul.f32 18.0, %v880_v8 }
  0xd7   : > { %v1216_v24 = vmax.f32 %v1184_v38, 0.0  ;;  %v605_v16 = vsub.f32 %v437_v39, %v2157_v36  ;;  %v976_v50 = vsub.f32 %v880_v8, %v2155_v35  ;;  %v261_v51 = vcvt.s32.f32 %v229_v40 }
  0xd8   : > { %1561 = vmatpush3.msra.mxu0 %v1233_v32  ;;  %v718_v52 = vmul.f32 %v686_v17, %v554_v23  ;;  %v537_v53 = vsub.f32 1.0, %v505_v46  ;;  %v944_v48 = vsub.f32 %v784_v49, %v912_v47  ;;  %v799_v45 = vcvt.s32.f32 %v767_v44 }
  0xd9   : > { %v1248_v54 = vmul.f32 %v1216_v24, %v1088_v27  ;;  %v637_v55 = vand.u32 2147483647, %v605_v16  ;;  %v1008_v18 = vand.u32 2147483647, %v976_v50  ;;  %v293_v56 = vadd.f32 0.5, %v261_v51 }
  0xda   : > { %1598 = vmatpush3.msra.mxu1 %v718_v52  ;;  %v569_v41 = vmax.f32 %v537_v53, 0.0  ;;  %v1104_v58 = vsub.f32 %v944_v48, %v2157_v36  ;;  %v831_v59 = vadd.f32 0.5, %v799_v45  ;;  %v244_v34 = vadd.s32 176, %v2125_v1 }
  0xdb   : > { %1562 = vmatprep.subr.mxu0 %v1248_v54  ;;  %v669_v57 = vsub.f32 1.0, %v637_v55  ;;  %v1040_v60 = vsub.f32 1.0, %v1008_v18  ;;  %v325_v61 = vmul.f32 0.055555556, %v293_v56  ;;  %v751_v62 = vadd.s32 256, %v229_v40 }
  0xdc   : > { %v1136_v28 = vand.u32 2147483647, %v1104_v58  ;;  %v863_v43 = vmul.f32 0.055555556, %v831_v59  ;;  %v276_v49 = vcvt.s32.f32 %v244_v34  ;;  %v2297_v37 = vadd.s32 48, %v2125_v1 }
  0xdd   : > { %v701_v63 = vmax.f32 %v669_v57, 0.0  ;;  %v1072_v0 = vmax.f32 %v1040_v60, 0.0  ;;  %v357_v2 = vfloor.f32 %v325_v61  ;;  %v783_v7 = vcvt.s32.f32 %v751_v62 }
  0xde   : > { %v1168_v3 = vsub.f32 1.0, %v1136_v28  ;;  %v895_v4 = vfloor.f32 %v863_v43  ;;  %v308_v6 = vadd.f32 0.5, %v276_v49  ;;  %v260_v10 = vcvt.s32.f32 %v2297_v37 }
  0xdf   : > { %v733_v42 = vmul.f32 %v701_v63, %v569_v41  ;;  %v389_v11 = vmul.f32 18.0, %v357_v2  ;;  %v457_v12 = vsub.f32 %v357_v2, %v2155_v35  ;;  %v815_v13 = vadd.f32 0.5, %v783_v7 }
  0xe0   : > { %v1200_v14 = vmax.f32 %v1168_v3, 0.0  ;;  %v927_v15 = vmul.f32 18.0, %v895_v4  ;;  %v991_v19 = vsub.f32 %v895_v4, %v2155_v35  ;;  %v340_v20 = vmul.f32 0.055555556, %v308_v6 }
  0xe1   : > { %1599 = vmatprep.subr.mxu1 %v733_v42  ;;  %v421_v21 = vsub.f32 %v261_v51, %v389_v11  ;;  %v489_v9 = vand.u32 2147483647, %v457_v12  ;;  %v847_v23 = vmul.f32 0.055555556, %v815_v13  ;;  %v292_v22 = vadd.f32 0.5, %v260_v10 }
  0xe2   : > { %v1232_v26 = vmul.f32 %v1200_v14, %v1072_v0  ;;  %v959_v25 = vsub.f32 %v799_v45, %v927_v15  ;;  %v1023_v27 = vand.u32 2147483647, %v991_v19  ;;  %v372_v29 = vfloor.f32 %v340_v20 }
  0xe3   : > { %v521_v30 = vsub.f32 1.0, %v489_v9  ;;  %v589_v5 = vsub.f32 %v421_v21, %v2157_v36  ;;  %v879_v31 = vfloor.f32 %v847_v23  ;;  %v324_v33 = vmul.f32 0.055555556, %v292_v22 }
  0xe4   : > { %1563 = vmatpush3.msra.mxu0 %v1232_v26  ;;  %v1055_v8 = vsub.f32 1.0, %v1023_v27  ;;  %v1119_v38 = vsub.f32 %v959_v25, %v2157_v36  ;;  %v404_v39 = vmul.f32 18.0, %v372_v29  ;;  %v472_v40 = vsub.f32 %v372_v29, %v2155_v35 }
  0xe5   : > { %v553_v44 = vmax.f32 %v521_v30, 0.0  ;;  %v621_v32 = vand.u32 2147483647, %v589_v5  ;;  %v911_v17 = vmul.f32 18.0, %v879_v31  ;;  %v975_v46 = vsub.f32 %v879_v31, %v2155_v35 }
  0xe6   : > { %v1087_v47 = vmax.f32 %v1055_v8, 0.0  ;;  %v1151_v24 = vand.u32 2147483647, %v1119_v38  ;;  %v436_v16 = vsub.f32 %v276_v49, %v404_v39  ;;  %v504_v50 = vand.u32 2147483647, %v472_v40 }
  0xe7   : > { %v653_v51 = vsub.f32 1.0, %v621_v32  ;;  %v943_v52 = vsub.f32 %v783_v7, %v911_v17  ;;  %v1007_v53 = vand.u32 2147483647, %v975_v46  ;;  %v356_v48 = vfloor.f32 %v324_v33 }
  0xe8   : > { %v1183_v45 = vsub.f32 1.0, %v1151_v24  ;;  %v536_v54 = vsub.f32 1.0, %v504_v50  ;;  %v604_v55 = vsub.f32 %v436_v16, %v2157_v36  ;;  %v766_v18 = vadd.s32 256, %v244_v34 }
  0xe9   : > { %v685_v56 = vmax.f32 %v653_v51, 0.0  ;;  %v1039_v41 = vsub.f32 1.0, %v1007_v53  ;;  %v1103_v58 = vsub.f32 %v943_v52, %v2157_v36  ;;  %v388_v59 = vmul.f32 18.0, %v356_v48 }
  0xea   : > { %v1215_v57 = vmax.f32 %v1183_v45, 0.0  ;;  %v568_v60 = vmax.f32 %v536_v54, 0.0  ;;  %v636_v61 = vand.u32 2147483647, %v604_v55  ;;  %v456_v62 = vsub.f32 %v356_v48, %v2155_v35 }
  0xeb   : > { %v717_v28 = vmul.f32 %v685_v56, %v553_v44  ;;  %v1071_v43 = vmax.f32 %v1039_v41, 0.0  ;;  %v1135_v49 = vand.u32 2147483647, %v1103_v58  ;;  %v420_v63 = vsub.f32 %v260_v10, %v388_v59 }
  0xec   : > { %v1247_v0 = vmul.f32 %v1215_v57, %v1087_v47  ;;  %v668_v2 = vsub.f32 1.0, %v636_v61  ;;  %v488_v7 = vand.u32 2147483647, %v456_v62  ;;  %v798_v3 = vcvt.s32.f32 %v766_v18 }
  0xed   : > { %1600 = vmatpush3.msra.mxu1 %v717_v28  ;;  %v1167_v34 = vsub.f32 1.0, %v1135_v49  ;;  %v588_v4 = vsub.f32 %v420_v63, %v2157_v36  ;;  %v243_v6 = vadd.s32 168, %v2125_v1  ;;  %v750_v42 = vadd.s32 256, %v2297_v37 }
  0xee   : > { %1564 = vmatprep.subr.mxu0 %v1247_v0  ;;  %v700_v11 = vmax.f32 %v668_v2, 0.0  ;;  %v520_v12 = vsub.f32 1.0, %v488_v7  ;;  %v830_v13 = vadd.f32 0.5, %v798_v3  ;;  %v227_v14 = vadd.s32 40, %v2125_v1 }
  0xef   : > { %v1199_v15 = vmax.f32 %v1167_v34, 0.0  ;;  %v620_v10 = vand.u32 2147483647, %v588_v4  ;;  %v275_v19 = vcvt.s32.f32 %v243_v6  ;;  %v782_v20 = vcvt.s32.f32 %v750_v42 }
  0xf0   : > { %v732_v21 = vmul.f32 %v700_v11, %v568_v60  ;;  %v552_v9 = vmax.f32 %v520_v12, 0.0  ;;  %v862_v23 = vmul.f32 0.055555556, %v830_v13  ;;  %v259_v22 = vcvt.s32.f32 %v227_v14 }
  0xf1   : > { %v1231_v26 = vmul.f32 %v1199_v15, %v1071_v43  ;;  %v652_v25 = vsub.f32 1.0, %v620_v10  ;;  %v307_v27 = vadd.f32 0.5, %v275_v19  ;;  %v814_v29 = vadd.f32 0.5, %v782_v20 }
  0xf2   : > { %1601 = vmatprep.subr.mxu1 %v732_v21  ;;  %v894_v37 = vfloor.f32 %v862_v23  ;;  %v291_v30 = vadd.f32 0.5, %v259_v22  ;;  %v2313_v5 = vadd.s32 256, %v243_v6  ;;  %v2316_v31 = vadd.s32 160, %v2125_v1 }
  0xf3   : > { %1565 = vmatpush3.msra.mxu0 %v1231_v26  ;;  %v684_v33 = vmax.f32 %v652_v25, 0.0  ;;  %v339_v8 = vmul.f32 0.055555556, %v307_v27  ;;  %v846_v38 = vmul.f32 0.055555556, %v814_v29  ;;  %v2318_v39 = vadd.s32 256, %v227_v14 }
  0xf4   : > { %v926_v40 = vmul.f32 18.0, %v894_v37  ;;  %v990_v44 = vsub.f32 %v894_v37, %v2155_v35  ;;  %v323_v32 = vmul.f32 0.055555556, %v291_v30  ;;  %v797_v17 = vcvt.s32.f32 %v2313_v5 }
  0xf5   : > { %v716_v46 = vmul.f32 %v684_v33, %v552_v9  ;;  %v371_v47 = vfloor.f32 %v339_v8  ;;  %v878_v24 = vfloor.f32 %v846_v38  ;;  %v274_v16 = vcvt.s32.f32 %v2316_v31 }
  0xf6   : > { %v958_v50 = vsub.f32 %v798_v3, %v926_v40  ;;  %v1022_v51 = vand.u32 2147483647, %v990_v44  ;;  %v355_v52 = vfloor.f32 %v323_v32  ;;  %v829_v53 = vadd.f32 0.5, %v797_v17 }
  0xf7   : > { %1602 = vmatpush3.msra.mxu1 %v716_v46  ;;  %v403_v48 = vmul.f32 18.0, %v371_v47  ;;  %v471_v45 = vsub.f32 %v371_v47, %v2155_v35  ;;  %v910_v54 = vmul.f32 18.0, %v878_v24  ;;  %v974_v55 = vsub.f32 %v878_v24, %v2155_v35 }
  0xf8   : > { %v1054_v18 = vsub.f32 1.0, %v1022_v51  ;;  %v1118_v56 = vsub.f32 %v958_v50, %v2157_v36  ;;  %v387_v41 = vmul.f32 18.0, %v355_v52  ;;  %v455_v58 = vsub.f32 %v355_v52, %v2155_v35 }
  0xf9   : > { %v435_v59 = vsub.f32 %v275_v19, %v403_v48  ;;  %v503_v57 = vand.u32 2147483647, %v471_v45  ;;  %v942_v60 = vsub.f32 %v782_v20, %v910_v54  ;;  %v1006_v61 = vand.u32 2147483647, %v974_v55 }
  0xfa   : > { %v1086_v62 = vmax.f32 %v1054_v18, 0.0  ;;  %v1150_v28 = vand.u32 2147483647, %v1118_v56  ;;  %v419_v43 = vsub.f32 %v259_v22, %v387_v41  ;;  %v487_v49 = vand.u32 2147483647, %v455_v58 }
  0xfb   : > { %v535_v63 = vsub.f32 1.0, %v503_v57  ;;  %v603_v0 = vsub.f32 %v435_v59, %v2157_v36  ;;  %v1038_v2 = vsub.f32 1.0, %v1006_v61  ;;  %v1102_v7 = vsub.f32 %v942_v60, %v2157_v36 }
  0xfc   : > { %v1182_v3 = vsub.f32 1.0, %v1150_v28  ;;  %v519_v34 = vsub.f32 1.0, %v487_v49  ;;  %v587_v4 = vsub.f32 %v419_v43, %v2157_v36  ;;  %v861_v6 = vmul.f32 0.055555556, %v829_v53 }
  0xfd   : > { %v567_v42 = vmax.f32 %v535_v63, 0.0  ;;  %v635_v11 = vand.u32 2147483647, %v603_v0  ;;  %v1070_v12 = vmax.f32 %v1038_v2, 0.0  ;;  %v1134_v13 = vand.u32 2147483647, %v1102_v7 }
  0xfe   : > { %v1214_v14 = vmax.f32 %v1182_v3, 0.0  ;;  %v551_v15 = vmax.f32 %v519_v34, 0.0  ;;  %v619_v10 = vand.u32 2147483647, %v587_v4  ;;  %v893_v19 = vfloor.f32 %v861_v6 }
  0xff   : > { %v667_v20 = vsub.f32 1.0, %v635_v11  ;;  %v1166_v21 = vsub.f32 1.0, %v1134_v13  ;;  %v306_v9 = vadd.f32 0.5, %v274_v16  ;;  %v781_v23 = vcvt.s32.f32 %v2318_v39 }
 0x100   : > { %v1246_v22 = vmul.f32 %v1214_v14, %v1086_v62  ;;  %v651_v26 = vsub.f32 1.0, %v619_v10  ;;  %v925_v25 = vmul.f32 18.0, %v893_v19  ;;  %v989_v27 = vsub.f32 %v893_v19, %v2155_v35 }
 0x101   : > { %v699_v29 = vmax.f32 %v667_v20, 0.0  ;;  %v1198_v37 = vmax.f32 %v1166_v21, 0.0  ;;  %v338_v30 = vmul.f32 0.055555556, %v306_v9  ;;  %v813_v5 = vadd.f32 0.5, %v781_v23 }
 0x102   : > { %1566 = vmatprep.subr.mxu0 %v1246_v22  ;;  %v683_v33 = vmax.f32 %v651_v26, 0.0  ;;  %v957_v8 = vsub.f32 %v797_v17, %v925_v25  ;;  %v1021_v38 = vand.u32 2147483647, %v989_v27  ;;  %v226_v40 = vadd.s32 32, %v2125_v1 }
 0x103   : > { %v731_v44 = vmul.f32 %v699_v29, %v567_v42  ;;  %v1230_v32 = vmul.f32 %v1198_v37, %v1070_v12  ;;  %v370_v46 = vfloor.f32 %v338_v30  ;;  %v845_v47 = vmul.f32 0.055555556, %v813_v5 }
 0x104   : > { %v715_v39 = vmul.f32 %v683_v33, %v551_v15  ;;  %v1053_v24 = vsub.f32 1.0, %v1021_v38  ;;  %v1117_v50 = vsub.f32 %v957_v8, %v2157_v36  ;;  %v258_v51 = vcvt.s32.f32 %v226_v40 }
 0x105   : > { %1603 = vmatprep.subr.mxu1 %v731_v44  ;;  %1567 = vmatpush3.msra.mxu0 %v1230_v32  ;;  %v402_v52 = vmul.f32 18.0, %v370_v46  ;;  %v470_v53 = vsub.f32 %v370_v46, %v2155_v35  ;;  %v877_v48 = vfloor.f32 %v845_v47  ;;  %v764_v17 = vadd.s32 256, %v2316_v31 }
 0x106   : > { %1604 = vmatpush3.msra.mxu1 %v715_v39  ;;  %v1085_v45 = vmax.f32 %v1053_v24, 0.0  ;;  %v1149_v54 = vand.u32 2147483647, %v1117_v50  ;;  %v290_v55 = vadd.f32 0.5, %v258_v51  ;;  %v241_v18 = vadd.s32 152, %v2125_v1 }
 0x107   : > { %v434_v56 = vsub.f32 %v274_v16, %v402_v52  ;;  %v502_v41 = vand.u32 2147483647, %v470_v53  ;;  %v909_v58 = vmul.f32 18.0, %v877_v48  ;;  %v973_v59 = vsub.f32 %v877_v48, %v2155_v35 }
 0x108   : > { %v1181_v57 = vsub.f32 1.0, %v1149_v54  ;;  %v322_v60 = vmul.f32 0.055555556, %v290_v55  ;;  %v796_v61 = vcvt.s32.f32 %v764_v17  ;;  %v273_v62 = vcvt.s32.f32 %v241_v18 }
 0x109   : > { %v534_v28 = vsub.f32 1.0, %v502_v41  ;;  %v602_v43 = vsub.f32 %v434_v56, %v2157_v36  ;;  %v941_v49 = vsub.f32 %v781_v23, %v909_v58  ;;  %v1005_v63 = vand.u32 2147483647, %v973_v59 }
 0x10a   : > { %v1213_v0 = vmax.f32 %v1181_v57, 0.0  ;;  %v354_v2 = vfloor.f32 %v322_v60  ;;  %v828_v7 = vadd.f32 0.5, %v796_v61  ;;  %v305_v3 = vadd.f32 0.5, %v273_v62 }
 0x10b   : > { %v566_v34 = vmax.f32 %v534_v28, 0.0  ;;  %v634_v31 = vand.u32 2147483647, %v602_v43  ;;  %v1037_v16 = vsub.f32 1.0, %v1005_v63  ;;  %v1101_v4 = vsub.f32 %v941_v49, %v2157_v36 }
 0x10c   : > { %v1245_v6 = vmul.f32 %v1213_v0, %v1085_v45  ;;  %v386_v42 = vmul.f32 18.0, %v354_v2  ;;  %v454_v11 = vsub.f32 %v354_v2, %v2155_v35  ;;  %v860_v12 = vmul.f32 0.055555556, %v828_v7 }
 0x10d   : > { %v666_v13 = vsub.f32 1.0, %v634_v31  ;;  %v1069_v14 = vmax.f32 %v1037_v16, 0.0  ;;  %v1133_v15 = vand.u32 2147483647, %v1101_v4  ;;  %v337_v10 = vmul.f32 0.055555556, %v305_v3 }
 0x10e   : > { %1568 = vmatprep.subr.mxu0 %v1245_v6  ;;  %v418_v19 = vsub.f32 %v258_v51, %v386_v42  ;;  %v486_v20 = vand.u32 2147483647, %v454_v11  ;;  %v892_v21 = vfloor.f32 %v860_v12  ;;  %v748_v9 = vadd.s32 256, %v226_v40 }
 0x10f   : > { %v698_v23 = vmax.f32 %v666_v13, 0.0  ;;  %v1165_v22 = vsub.f32 1.0, %v1133_v15  ;;  %v369_v26 = vfloor.f32 %v337_v10  ;;  %v225_v25 = vadd.s32 24, %v2125_v1 }
 0x110   : > { %v518_v27 = vsub.f32 1.0, %v486_v20  ;;  %v586_v29 = vsub.f32 %v418_v19, %v2157_v36  ;;  %v924_v37 = vmul.f32 18.0, %v892_v21  ;;  %v988_v30 = vsub.f32 %v892_v21, %v2155_v35 }
 0x111   : > { %v730_v5 = vmul.f32 %v698_v23, %v566_v34  ;;  %v1197_v33 = vmax.f32 %v1165_v22, 0.0  ;;  %v401_v8 = vmul.f32 18.0, %v369_v26  ;;  %v469_v38 = vsub.f32 %v369_v26, %v2155_v35 }
 0x112   : > { %v550_v44 = vmax.f32 %v518_v27, 0.0  ;;  %v618_v32 = vand.u32 2147483647, %v586_v29  ;;  %v956_v46 = vsub.f32 %v796_v61, %v924_v37  ;;  %v1020_v40 = vand.u32 2147483647, %v988_v30 }
 0x113   : > { %1605 = vmatprep.subr.mxu1 %v730_v5  ;;  %v1229_v47 = vmul.f32 %v1197_v33, %v1069_v14  ;;  %v433_v39 = vsub.f32 %v273_v62, %v401_v8  ;;  %v501_v24 = vand.u32 2147483647, %v469_v38  ;;  %v780_v50 = vcvt.s32.f32 %v748_v9 }
 0x114   : > { %v650_v51 = vsub.f32 1.0, %v618_v32  ;;  %v1052_v52 = vsub.f32 1.0, %v1020_v40  ;;  %v1116_v53 = vsub.f32 %v956_v46, %v2157_v36  ;;  %v257_v48 = vcvt.s32.f32 %v225_v25 }
 0x115   : > { %1569 = vmatpush3.msra.mxu0 %v1229_v47  ;;  %v533_v17 = vsub.f32 1.0, %v501_v24  ;;  %v601_v45 = vsub.f32 %v433_v39, %v2157_v36  ;;  %v812_v54 = vadd.f32 0.5, %v780_v50  ;;  %v763_v55 = vadd.s32 256, %v241_v18 }
 0x116   : > { %v682_v56 = vmax.f32 %v650_v51, 0.0  ;;  %v1084_v41 = vmax.f32 %v1052_v52, 0.0  ;;  %v1148_v58 = vand.u32 2147483647, %v1116_v53  ;;  %v289_v59 = vadd.f32 0.5, %v257_v48 }
 0x117   : > { %v565_v57 = vmax.f32 %v533_v17, 0.0  ;;  %v633_v60 = vand.u32 2147483647, %v601_v45  ;;  %v844_v61 = vmul.f32 0.055555556, %v812_v54  ;;  %v795_v62 = vcvt.s32.f32 %v763_v55 }
 0x118   : > { %v714_v28 = vmul.f32 %v682_v56, %v550_v44  ;;  %v1180_v43 = vsub.f32 1.0, %v1148_v58  ;;  %v321_v49 = vmul.f32 0.055555556, %v289_v59  ;;  %v2352_v63 = vadd.s32 144, %v2125_v1 }
 0x119   : > { %v665_v0 = vsub.f32 1.0, %v633_v60  ;;  %v876_v2 = vfloor.f32 %v844_v61  ;;  %v827_v7 = vadd.f32 0.5, %v795_v62  ;;  %v2354_v3 = vadd.s32 256, %v225_v25 }
 0x11a   : > { %1606 = vmatpush3.msra.mxu1 %v714_v28  ;;  %v1212_v18 = vmax.f32 %v1180_v43, 0.0  ;;  %v353_v34 = vfloor.f32 %v321_v49  ;;  %v272_v31 = vcvt.s32.f32 %v2352_v63  ;;  %v2358_v16 = vadd.s32 16, %v2125_v1 }
 0x11b   : > { %v697_v4 = vmax.f32 %v665_v0, 0.0  ;;  %v908_v6 = vmul.f32 18.0, %v876_v2  ;;  %v972_v42 = vsub.f32 %v876_v2, %v2155_v35  ;;  %v859_v11 = vmul.f32 0.055555556, %v827_v7 }
 0x11c   : > { %v1244_v12 = vmul.f32 %v1212_v18, %v1084_v41  ;;  %v385_v13 = vmul.f32 18.0, %v353_v34  ;;  %v453_v14 = vsub.f32 %v353_v34, %v2155_v35  ;;  %v304_v15 = vadd.f32 0.5, %v272_v31 }
 0x11d   : > { %v729_v10 = vmul.f32 %v697_v4, %v565_v57  ;;  %v940_v19 = vsub.f32 %v780_v50, %v908_v6  ;;  %v1004_v20 = vand.u32 2147483647, %v972_v42  ;;  %v891_v21 = vfloor.f32 %v859_v11 }
 0x11e   : > { %1570 = vmatprep.subr.mxu0 %v1244_v12  ;;  %v417_v9 = vsub.f32 %v257_v48, %v385_v13  ;;  %v485_v23 = vand.u32 2147483647, %v453_v14  ;;  %v336_v22 = vmul.f32 0.055555556, %v304_v15  ;;  %v779_v26 = vcvt.s32.f32 %v2354_v3 }
 0x11f   : > { %1607 = vmatprep.subr.mxu1 %v729_v10  ;;  %v1036_v25 = vsub.f32 1.0, %v1004_v20  ;;  %v1100_v27 = vsub.f32 %v940_v19, %v2157_v36  ;;  %v923_v29 = vmul.f32 18.0, %v891_v21  ;;  %v987_v37 = vsub.f32 %v891_v21, %v2155_v35 }
 0x120   : > { %v517_v30 = vsub.f32 1.0, %v485_v23  ;;  %v585_v5 = vsub.f32 %v417_v9, %v2157_v36  ;;  %v368_v33 = vfloor.f32 %v336_v22  ;;  %v811_v8 = vadd.f32 0.5, %v779_v26 }
 0x121   : > { %v1068_v38 = vmax.f32 %v1036_v25, 0.0  ;;  %v1132_v44 = vand.u32 2147483647, %v1100_v27  ;;  %v955_v32 = vsub.f32 %v795_v62, %v923_v29  ;;  %v1019_v46 = vand.u32 2147483647, %v987_v37 }
 0x122   : > { %v549_v40 = vmax.f32 %v517_v30, 0.0  ;;  %v617_v47 = vand.u32 2147483647, %v585_v5  ;;  %v400_v39 = vmul.f32 18.0, %v368_v33  ;;  %v468_v24 = vsub.f32 %v368_v33, %v2155_v35 }
 0x123   : > { %v1164_v50 = vsub.f32 1.0, %v1132_v44  ;;  %v1051_v51 = vsub.f32 1.0, %v1019_v46  ;;  %v1115_v52 = vsub.f32 %v955_v32, %v2157_v36  ;;  %v843_v53 = vmul.f32 0.055555556, %v811_v8 }
 0x124   : > { %v649_v48 = vsub.f32 1.0, %v617_v47  ;;  %v432_v17 = vsub.f32 %v272_v31, %v400_v39  ;;  %v500_v45 = vand.u32 2147483647, %v468_v24  ;;  %v256_v54 = vcvt.s32.f32 %v2358_v16 }
 0x125   : > { %v1196_v55 = vmax.f32 %v1164_v50, 0.0  ;;  %v1083_v56 = vmax.f32 %v1051_v51, 0.0  ;;  %v1147_v41 = vand.u32 2147483647, %v1115_v52  ;;  %v875_v58 = vfloor.f32 %v843_v53 }
 0x126   : > { %v681_v59 = vmax.f32 %v649_v48, 0.0  ;;  %v532_v57 = vsub.f32 1.0, %v500_v45  ;;  %v600_v60 = vsub.f32 %v432_v17, %v2157_v36  ;;  %v288_v61 = vadd.f32 0.5, %v256_v54 }
 0x127   : > { %v1228_v62 = vmul.f32 %v1196_v55, %v1068_v38  ;;  %v1179_v28 = vsub.f32 1.0, %v1147_v41  ;;  %v907_v43 = vmul.f32 18.0, %v875_v58  ;;  %v971_v49 = vsub.f32 %v875_v58, %v2155_v35 }
 0x128   : > { %v713_v0 = vmul.f32 %v681_v59, %v549_v40  ;;  %v564_v2 = vmax.f32 %v532_v57, 0.0  ;;  %v632_v7 = vand.u32 2147483647, %v600_v60  ;;  %v320_v3 = vmul.f32 0.055555556, %v288_v61 }
 0x129   : > { %1571 = vmatpush3.msra.mxu0 %v1228_v62  ;;  %v1211_v18 = vmax.f32 %v1179_v28, 0.0  ;;  %v939_v34 = vsub.f32 %v779_v26, %v907_v43  ;;  %v1003_v31 = vand.u32 2147483647, %v971_v49  ;;  %v762_v4 = vadd.s32 256, %v2352_v63 }
 0x12a   : > { %1608 = vmatpush3.msra.mxu1 %v713_v0  ;;  %v664_v6 = vsub.f32 1.0, %v632_v7  ;;  %v352_v42 = vfloor.f32 %v320_v3  ;;  %v239_v11 = vadd.s32 136, %v2125_v1  ;;  %v746_v12 = vadd.s32 256, %v2358_v16 }
 0x12b   : > { %v1243_v13 = vmul.f32 %v1211_v18, %v1083_v56  ;;  %v1035_v14 = vsub.f32 1.0, %v1003_v31  ;;  %v1099_v15 = vsub.f32 %v939_v34, %v2157_v36  ;;  %v794_v10 = vcvt.s32.f32 %v762_v4 }
 0x12c   : > { %v696_v19 = vmax.f32 %v664_v6, 0.0  ;;  %v384_v20 = vmul.f32 18.0, %v352_v42  ;;  %v452_v21 = vsub.f32 %v352_v42, %v2155_v35  ;;  %v271_v9 = vcvt.s32.f32 %v239_v11 }
 0x12d   : > { %1572 = vmatprep.subr.mxu0 %v1243_v13  ;;  %v1067_v23 = vmax.f32 %v1035_v14, 0.0  ;;  %v1131_v63 = vand.u32 2147483647, %v1099_v15  ;;  %v826_v22 = vadd.f32 0.5, %v794_v10  ;;  %v778_v26 = vcvt.s32.f32 %v746_v12 }
 0x12e   : > { %v728_v25 = vmul.f32 %v696_v19, %v564_v2  ;;  %v416_v27 = vsub.f32 %v256_v54, %v384_v20  ;;  %v484_v29 = vand.u32 2147483647, %v452_v21  ;;  %v303_v37 = vadd.f32 0.5, %v271_v9 }
 0x12f   : > { %v1163_v16 = vsub.f32 1.0, %v1131_v63  ;;  %v858_v30 = vmul.f32 0.055555556, %v826_v22  ;;  %v810_v5 = vadd.f32 0.5, %v778_v26  ;;  %v223_v33 = vadd.s32 8, %v2125_v1 }
 0x130   : > { %1609 = vmatprep.subr.mxu1 %v728_v25  ;;  %v516_v8 = vsub.f32 1.0, %v484_v29  ;;  %v584_v38 = vsub.f32 %v416_v27, %v2157_v36  ;;  %v335_v44 = vmul.f32 0.055555556, %v303_v37  ;;  %v2378_v32 = vadd.s32 256, %v239_v11 }
 0x131   : > { %v1195_v46 = vmax.f32 %v1163_v16, 0.0  ;;  %v890_v40 = vfloor.f32 %v858_v30  ;;  %v842_v47 = vmul.f32 0.055555556, %v810_v5  ;;  %v255_v39 = vcvt.s32.f32 %v223_v33 }
 0x132   : > { %v548_v24 = vmax.f32 %v516_v8, 0.0  ;;  %v616_v50 = vand.u32 2147483647, %v584_v38  ;;  %v367_v51 = vfloor.f32 %v335_v44  ;;  %v793_v52 = vcvt.s32.f32 %v2378_v32 }
 0x133   : > { %v1227_v53 = vmul.f32 %v1195_v46, %v1067_v23  ;;  %v922_v48 = vmul.f32 18.0, %v890_v40  ;;  %v986_v17 = vsub.f32 %v890_v40, %v2155_v35  ;;  %v874_v45 = vfloor.f32 %v842_v47  ;;  %v2394_v40 = vld [vmem:[%s191_s6] sm:$0xff] }
 0x134   : > { %v648_v54 = vsub.f32 1.0, %v616_v50  ;;  %v399_v55 = vmul.f32 18.0, %v367_v51  ;;  %v467_v56 = vsub.f32 %v367_v51, %v2155_v35  ;;  %v287_v41 = vadd.f32 0.5, %v255_v39 }
 0x135   : > { %1573 = vmatpush3.msra.mxu0 %v1227_v53  ;;  %v954_v58 = vsub.f32 %v794_v10, %v922_v48  ;;  %v1018_v59 = vand.u32 2147483647, %v986_v17  ;;  %v906_v57 = vmul.f32 18.0, %v874_v45  ;;  %v970_v60 = vsub.f32 %v874_v45, %v2155_v35 }
 0x136   : > { %v680_v61 = vmax.f32 %v648_v54, 0.0  ;;  %v431_v62 = vsub.f32 %v271_v9, %v399_v55  ;;  %v499_v28 = vand.u32 2147483647, %v467_v56  ;;  %v319_v43 = vmul.f32 0.055555556, %v287_v41 }
 0x137   : > { %v1050_v49 = vsub.f32 1.0, %v1018_v59  ;;  %v1114_v0 = vsub.f32 %v954_v58, %v2157_v36  ;;  %v938_v2 = vsub.f32 %v778_v26, %v906_v57  ;;  %v1002_v7 = vand.u32 2147483647, %v970_v60 }
 0x138   : > { %v712_v3 = vmul.f32 %v680_v61, %v548_v24  ;;  %v531_v18 = vsub.f32 1.0, %v499_v28  ;;  %v599_v34 = vsub.f32 %v431_v62, %v2157_v36  ;;  %v351_v31 = vfloor.f32 %v319_v43 }
 0x139   : > { %v1082_v4 = vmax.f32 %v1050_v49, 0.0  ;;  %v1146_v6 = vand.u32 2147483647, %v1114_v0  ;;  %v1034_v42 = vsub.f32 1.0, %v1002_v7  ;;  %v1098_v11 = vsub.f32 %v938_v2, %v2157_v36 }
 0x13a   : > { %1610 = vmatpush3.msra.mxu1 %v712_v3  ;;  %v563_v12 = vmax.f32 %v531_v18, 0.0  ;;  %v631_v13 = vand.u32 2147483647, %v599_v34  ;;  %v383_v14 = vmul.f32 18.0, %v351_v31  ;;  %v451_v15 = vsub.f32 %v351_v31, %v2155_v35 }
 0x13b   : > { %v1178_v10 = vsub.f32 1.0, %v1146_v6  ;;  %v1066_v19 = vmax.f32 %v1034_v42, 0.0  ;;  %v1130_v20 = vand.u32 2147483647, %v1098_v11  ;;  %v825_v21 = vadd.f32 0.5, %v793_v52 }
 0x13c   : > { %v663_v9 = vsub.f32 1.0, %v631_v13  ;;  %v415_v23 = vsub.f32 %v255_v39, %v383_v14  ;;  %v483_v63 = vand.u32 2147483647, %v451_v15  ;;  %v238_v22 = vadd.s32 128, %v2125_v1 }
 0x13d   : > { %v1210_v26 = vmax.f32 %v1178_v10, 0.0  ;;  %v1162_v25 = vsub.f32 1.0, %v1130_v20  ;;  %v857_v27 = vmul.f32 0.055555556, %v825_v21  ;;  %v745_v29 = vadd.s32 256, %v223_v33 }
 0x13e   : > { %v695_v37 = vmax.f32 %v663_v9, 0.0  ;;  %v515_v16 = vsub.f32 1.0, %v483_v63  ;;  %v583_v30 = vsub.f32 %v415_v23, %v2157_v36  ;;  %v270_v5 = vcvt.s32.f32 %v238_v22 }
 0x13f   : > { %v1242_v8 = vmul.f32 %v1210_v26, %v1082_v4  ;;  %v1194_v38 = vmax.f32 %v1162_v25, 0.0  ;;  %v889_v44 = vfloor.f32 %v857_v27  ;;  %v777_v46 = vcvt.s32.f32 %v745_v29  ;;  %v1541_v29 = vld [vmem:[%s191_s6 + $0x8] sm:$0xff] }
 0x140   : > { %v727_v47 = vmul.f32 %v695_v37, %v563_v12  ;;  %v547_v39 = vmax.f32 %v515_v16, 0.0  ;;  %v615_v24 = vand.u32 2147483647, %v583_v30  ;;  %v302_v50 = vadd.f32 0.5, %v270_v5 }
 0x141   : > { %1574 = vmatprep.subr.mxu0 %v1242_v8  ;;  %v1226_v51 = vmul.f32 %v1194_v38, %v1066_v19  ;;  %v921_v53 = vmul.f32 18.0, %v889_v44  ;;  %v985_v33 = vsub.f32 %v889_v44, %v2155_v35  ;;  %v809_v48 = vadd.f32 0.5, %v777_v46 }
 0x142   : > { %1611 = vmatprep.subr.mxu1 %v727_v47  ;;  %v647_v17 = vsub.f32 1.0, %v615_v24  ;;  %v334_v45 = vmul.f32 0.055555556, %v302_v50  ;;  %v254_v54 = vcvt.s32.f32 %v2125_v1  ;;  %v1330_v55 = vcombine.high %v2394_v40, %v2394_v40 }
 0x143   : > { %1575 = vmatpush3.msra.mxu0 %v1226_v51  ;;  %v953_v56 = vsub.f32 %v793_v52, %v921_v53  ;;  %v1017_v41 = vand.u32 2147483647, %v985_v33  ;;  %v841_v58 = vmul.f32 0.055555556, %v809_v48  ;;  %v760_v59 = vadd.s32 256, %v238_v22 }
 0x144   : > { %v679_v57 = vmax.f32 %v647_v17, 0.0  ;;  %v366_v60 = vfloor.f32 %v334_v45  ;;  %v286_v61 = vadd.f32 0.5, %v254_v54  ;;  %1396 = vmatprep.mubr.f32.mxu1 %v1330_v55  ;;  %v2403_v62 = vadd.s32 256, %v2125_v1 }
 0x145   : > { %v1049_v28 = vsub.f32 1.0, %v1017_v41  ;;  %v1113_v43 = vsub.f32 %v953_v56, %v2157_v36  ;;  %v873_v49 = vfloor.f32 %v841_v58  ;;  %v792_v0 = vcvt.s32.f32 %v760_v59 }
 0x146   : > { %v711_v2 = vmul.f32 %v679_v57, %v547_v39  ;;  %v398_v7 = vmul.f32 18.0, %v366_v60  ;;  %v466_v32 = vsub.f32 %v366_v60, %v2155_v35  ;;  %v318_v52 = vmul.f32 0.055555556, %v286_v61 }
 0x147   : > { %v1081_v3 = vmax.f32 %v1049_v28, 0.0  ;;  %v1145_v18 = vand.u32 2147483647, %v1113_v43  ;;  %v905_v34 = vmul.f32 18.0, %v873_v49  ;;  %v969_v31 = vsub.f32 %v873_v49, %v2155_v35 }
 0x148   : > { %1612 = vmatpush3.msra.mxu1 %v711_v2  ;;  %v430_v4 = vsub.f32 %v270_v5, %v398_v7  ;;  %v498_v6 = vand.u32 2147483647, %v466_v32  ;;  %v350_v1 = vfloor.f32 %v318_v52  ;;  %v824_v42 = vadd.f32 0.5, %v792_v0 }
 0x149   : > { %v1177_v11 = vsub.f32 1.0, %v1145_v18  ;;  %v937_v12 = vsub.f32 %v777_v46, %v905_v34  ;;  %v1001_v13 = vand.u32 2147483647, %v969_v31  ;;  %v776_v14 = vcvt.s32.f32 %v2403_v62 }
 0x14a   : > { %v530_v15 = vsub.f32 1.0, %v498_v6  ;;  %v598_v10 = vsub.f32 %v430_v4, %v2157_v36  ;;  %v382_v19 = vmul.f32 18.0, %v350_v1  ;;  %v450_v20 = vsub.f32 %v350_v1, %v2155_v35 }
 0x14b   : > { %v1209_v21 = vmax.f32 %v1177_v11, 0.0  ;;  %v1033_v9 = vsub.f32 1.0, %v1001_v13  ;;  %v1097_v23 = vsub.f32 %v937_v12, %v2157_v36  ;;  %v856_v63 = vmul.f32 0.055555556, %v824_v42 }
 0x14c   : > { %v562_v22 = vmax.f32 %v530_v15, 0.0  ;;  %v630_v26 = vand.u32 2147483647, %v598_v10  ;;  %v414_v25 = vsub.f32 %v254_v54, %v382_v19  ;;  %v482_v27 = vand.u32 2147483647, %v450_v20 }
 0x14d   : > { %v1241_v37 = vmul.f32 %v1209_v21, %v1081_v3  ;;  %v1065_v16 = vmax.f32 %v1033_v9, 0.0  ;;  %v1129_v30 = vand.u32 2147483647, %v1097_v23  ;;  %v888_v5 = vfloor.f32 %v856_v63 }
 0x14e   : > { %v662_v8 = vsub.f32 1.0, %v630_v26  ;;  %v514_v38 = vsub.f32 1.0, %v482_v27  ;;  %v582_v44 = vsub.f32 %v414_v25, %v2157_v36  ;;  %v808_v46 = vadd.f32 0.5, %v776_v14 }
 0x14f   : > { %1576 = vmatprep.subr.mxu0 %v1241_v37  ;;  %v1161_v47 = vsub.f32 1.0, %v1129_v30  ;;  %v920_v39 = vmul.f32 18.0, %v888_v5  ;;  %v984_v24 = vsub.f32 %v888_v5, %v2155_v35  ;;  %v1257_v50 = vcombine.high %v1541_v29, %v1541_v29 }
 0x150   : > { %v694_v51 = vmax.f32 %v662_v8, 0.0  ;;  %v614_v53 = vand.u32 2147483647, %v582_v44  ;;  %v840_v33 = vmul.f32 0.055555556, %v808_v46  ;;  %v546_v55 = vmax.f32 %v514_v38, 0.0 }
 0x151   : > { %v1193_v48 = vmax.f32 %v1161_v47, 0.0  ;;  %v952_v17 = vsub.f32 %v792_v0, %v920_v39  ;;  %v1016_v45 = vand.u32 2147483647, %v984_v24  ;;  %1323 = vmatprep.mubr.f32.mxu0 %v1257_v50 }
 0x152   : > { %v726_v54 = vmul.f32 %v694_v51, %v562_v22  ;;  %v646_v56 = vsub.f32 1.0, %v614_v53  ;;  %v872_v41 = vfloor.f32 %v840_v33 }
 0x153   : > { %v1225_v58 = vmul.f32 %v1193_v48, %v1065_v16  ;;  %v1048_v59 = vsub.f32 1.0, %v1016_v45  ;;  %v1112_v57 = vsub.f32 %v952_v17, %v2157_v36 }
 0x154   : > { %1613 = vmatprep.subr.mxu1 %v726_v54  ;;  %v678_v60 = vmax.f32 %v646_v56, 0.0  ;;  %v904_v61 = vmul.f32 18.0, %v872_v41  ;;  %v968_v62 = vsub.f32 %v872_v41, %v2155_v35 }
 0x155   : > { %1577 = vmatpush3.msra.mxu0 %v1225_v58  ;;  %v1144_v28 = vand.u32 2147483647, %v1112_v57  ;;  %v1080_v2 = vmax.f32 %v1048_v59, 0.0 }
 0x156   : > { %v710_v43 = vmul.f32 %v678_v60, %v546_v55  ;;  %v936_v49 = vsub.f32 %v776_v14, %v904_v61  ;;  %v1000_v0 = vand.u32 2147483647, %v968_v62 }
 0x157   : > { %v1176_v7 = vsub.f32 1.0, %v1144_v28 }
 0x158   : > { %1614 = vmatpush3.msra.mxu1 %v710_v43  ;;  %v1032_v32 = vsub.f32 1.0, %v1000_v0  ;;  %v1096_v52 = vsub.f32 %v936_v49, %v2157_v36 }
 0x159   : > { %v1208_v3 = vmax.f32 %v1176_v7, 0.0  ;;  %1397 = vmatmul.mubr.f32.vlgmr.msra.gmra.mxu1 %v2394_v40 }
 0x15a   : > { %v1128_v18 = vand.u32 2147483647, %v1096_v52  ;;  %v1064_v35 = vmax.f32 %v1032_v32, 0.0 }
 0x15b   : > { %v1240_v34 = vmul.f32 %v1208_v3, %v1080_v2 }
 0x15c   : > { %v1160_v31 = vsub.f32 1.0, %v1128_v18 }
 0x15d   : > { %1578 = vmatprep.subr.mxu0 %v1240_v34 }
 0x15e   : > { %v1192_v4 = vmax.f32 %v1160_v31, 0.0 }
 0x160   : > { %v1224_v6 = vmul.f32 %v1192_v4, %v1064_v35 }
 0x162   : > { %1579 = vmatpush3.msra.mxu0 %v1224_v6 }
 0x163   : > { %1324 = vmatmul.mubr.f32.vlgmr.msra.gmra.mxu0 %v1541_v29 }
 0x219   : > { %v1615_v1 = vpop.f32.mrf.mxu1 }
 0x21b   : > { %v1616_v36 = vpop.f32.mrf.mxu1 }
 0x21c   : > { %v1617_v40 = vadd.f32 %v1616_v36, %v1615_v1 }
 0x223   : > { %v1580_v42 = vpop.f32.mrf.mxu0 }
 0x225   : > { %v1581_v11 = vpop.f32.mrf.mxu0 }
 0x226   : > { %v1582_v12 = vadd.f32 %v1581_v11, %v1580_v42 }
 0x228   : > { %v1399_v13 = vadd.f32 %v1617_v40, %v1582_v12 }
 0x22a   : > { %1402 = vst [vmem:[%s216_s22] sm:$0xf] %v1399_v13 }
 0x22b   : > { %1798 = shalt.err (!%p1795_p10)
}
 0x22c   : > { %s1799_s14 = scalar_lea.hbm %s1417_s3, 64  ;;  %s1803_s4 = scalar_lea.hbm %s2478_s2, 256 }
 0x22d   : > { %p1800_p1 = scmp.ne.s32.totalorder %s1417_s3, %s1799_s14  ;;  %p1804_p11 = scmp.lt.s32.totalorder %s1417_s3, %s2478_s2 }
 0x22e   : > { %p1805_p0 = scmp.lt.s32.totalorder %s1803_s4, %s1799_s14 }
 0x22f   : > { %p1801_p6 = pnand %p1800_p1, %p2501_p4 }
 0x230   : > { %p1806_p5 = por %p1805_p0, %p1804_p11 }
 0x231   : > { %p1802_p9 = pneg %p1801_p6 }
 0x233   : > { %p1807_p7 = pnand %p1806_p5, %p1802_p9 }
 0x235   : > { %1810 = shalt.err (!%p1807_p7)
}
 0x236   : > { %1622 = dma.vmem_to_hbm [thread:$0]  (%p2501_p4), %s1420_s20, 64, %s1417_s3, %s1404_s21  }
 0x237 PF: > { %p1636_p3 = scmp.ge.s32.totalorder %s1909_s19, 2  ;;  %s1431_s7 = sand.u32 1, %s1881_s12  }
 0x238   : > { %p2502_p12 = scmp.ne.s32.totalorder %s2495_s9, 0  ;;  %s1432_s26 = scalar_lea.sflag [#allocation4], %s1431_s7 }
 0x23a   : > { %p1632_p8 = pnand %p1636_p3, %p2502_p12 }
 0x23c   : > { %p1633_p13 = pneg %p1632_p8 }
 0x23e   : > { %1864 = dma.done.wait (%p1633_p13), %s1432_s26, 64  }
 0x23f   : > { %1866 = vsyncadd (%p1633_p13), %s1432_s26, 4294967232  ;;  %s21_s19 = sadd.s32 1, %s1909_s19   ;;  %s2503_s8 = sld [smem:[#allocation11_spill]] }
 0x240   : > { %p18_p2 = scmp.ge.s32.totalorder %s21_s19, 6   ;;  %s2504_s14 = sld [smem:[#allocation14_spill]] }
 0x241   : > { %s2505_s28 = sld [smem:[#allocation12_spill]]  ;;  %s2507_s9 = smov %s1873_s10 }
 0x242   : > { %s2506_s22 = sld [smem:[#allocation13_spill]]  ;;  %s2508_s10 = smov %s1877_s11 }
 0x243   : > { %s2509_s11 = smov %s2039_s5  ;;  %s2510_s12 = smov %s1885_s13 }
 0x244   : > { %s2512_s15 = smov %s1901_s17  ;;  %s2513_s16 = smov %s1905_s18 }
 0x245   : > { %s2511_s13 = smov %s2503_s8  ;;  %20 = sbr.rel (!%p18_p2) target bundleno = 13 (0xd), region = 87 }
 0x247   : > { %s2514_s17 = smov %s2505_s28 }
 0x248   : > { %s2515_s18 = smov %s2506_s22 }
 0x24a   :  { %1437 = vsyncpa [#allocation3], 1 }
 0x24b   :  { %1439 = vsyncpa [#allocation3 + $0x1], 1 }
 0x24c   :  { %1440 = vsyncpa [#allocation6], 1 }
 0x24d   :  { %1442 = vsyncpa [#allocation6 + $0x1], 1 }
 0x24e   :  { %1443 = vsyncpa [#allocation4], 1 }
 0x24f   :  { %1445 = vsyncpa [#allocation4 + $0x1], 1 }

</bundles_post_ra>
